<compile_context>
chip_gen: v5e
topology: v5e:2x2
jax: 0.10.0
libtpu: 0.0.40
codegen_flags: <defaults>
</compile_context>

<pallas_src>
import numpy as np
import jax
import jax.numpy as jnp
from jax.experimental import pallas as pl
from jax.experimental.pallas import tpu as pltpu


# ----------------------------------------------------------------------------
# Filter construction (deterministic "parameter init" glue, not the hot path).
# ----------------------------------------------------------------------------
def _gauss_hat(T, xi, sigma):
    freqs = np.fft.fftfreq(T)  # cycles / sample, in [-0.5, 0.5)
    return np.exp(-((freqs - xi) ** 2) / (2.0 * sigma ** 2))


def build_scattering_filters(J, Q, T, filter_dtype=jnp.bfloat16):
    # TODO(synk): kymatio's exact Morlet filterbank (corrective DC terms,
    # adaptive xi/sigma placement, signal padding/unpadding, per-stage
    # oversampling) has no clean closed form here; Gaussian analytic
    # band-pass filters with the same J/Q octave structure are used instead.
    xi_max = 0.35
    n1 = J * Q
    n2 = J
    t_idx = np.arange(T)
    # M[s, t] = h[(t - s) % T]  so that  (x @ M)[t] = sum_s x[s] h[(t-s) % T]
    circ = (t_idx[None, :] - t_idx[:, None]) % T

    # First-order filters, concatenated along the output (lane) axis:
    #   psi1_cat[:, i*T:(i+1)*T]            = real part of filter i
    #   psi1_cat[:, (n1+i)*T:(n1+i+1)*T]    = imag part of filter i
    psi1_cat = np.zeros((T, 2 * n1 * T), dtype=np.float32)
    j1_list = []
    for i in range(n1):
        xi = xi_max * 2.0 ** (-i / Q)
        sigma = 0.6 * xi * (2.0 ** (1.0 / Q) - 1.0)
        h = np.fft.ifft(_gauss_hat(T, xi, sigma))
        M = h[circ]
        psi1_cat[:, i * T:(i + 1) * T] = M.real
        psi1_cat[:, (n1 + i) * T:(n1 + i + 1) * T] = M.imag
        j1_list.append(i // Q)

    # Second-order filters: (n2, T, 2T) with [real | imag] along the last axis.
    psi2_cat = np.zeros((n2, T, 2 * T), dtype=np.float32)
    j2_list = []
    for j in range(n2):
        xi = xi_max * 2.0 ** (-j)
        sigma = 0.6 * xi
        h = np.fft.ifft(_gauss_hat(T, xi, sigma))
        M = h[circ]
        psi2_cat[j, :, :T] = M.real
        psi2_cat[j, :, T:] = M.imag
        j2_list.append(j)

    # Low-pass phi with the 2**J subsampling folded into the matmul matrix:
    # phi_ds_T[s, m] = phi[(m * 2**J - s) % T]   -> (x @ phi_ds_T) is the
    # low-pass-filtered signal sampled every 2**J steps.
    sigma_low = xi_max * 2.0 ** (-J)
    phi_hat = np.exp(-(np.fft.fftfreq(T) ** 2) / (2.0 * sigma_low ** 2))
    phi = np.fft.ifft(phi_hat).real
    Tout = T // (2 ** J)
    m = np.arange(Tout)
    phi_ds_T = phi[(m[None, :] * (2 ** J) - t_idx[:, None]) % T]  # (T, Tout)

    # Second-order paths: keep (i1, i2) with j2 > j1 (standard scattering rule),
    # lexicographic (i1-major) order = kymatio's channel ordering convention.
    pairs = [(i1, i2) for i1 in range(n1) for i2 in range(n2)
             if j2_list[i2] > j1_list[i1]]
    pair_chan = {p: 1 + n1 + idx for idx, p in enumerate(pairs)}

    # Group second-order work by i2. Since j1_list is non-decreasing in i1, the
    # valid i1 set for a given i2 is always the prefix {0, ..., k-1}.
    groups = []
    for i2 in range(n2):
        k = sum(1 for j1 in j1_list if j1 < j2_list[i2])
        if k > 0:
            groups.append((i2, k))

    meta = dict(n1=n1, n2=n2, n_pairs=len(pairs), Tout=Tout,
                groups=groups, pair_chan=pair_chan)
    return dict(
        psi1_cat=jnp.asarray(psi1_cat, dtype=filter_dtype),
        psi2_cat=jnp.asarray(psi2_cat, dtype=filter_dtype),
        phi_ds_T=jnp.asarray(phi_ds_T, dtype=filter_dtype),
        meta=meta,
    )


# ----------------------------------------------------------------------------
# Fused Pallas kernel (hot path): order 0 + 1 + 2 in one invocation.
# ----------------------------------------------------------------------------
def _make_scatter_kernel(B, T, Tout, n1, groups, pair_chan):
    def kernel(x_ref, psi1_ref, psi2_ref, phi_ref, out_ref, u1_ref):
        cdt = psi1_ref.dtype                       # bf16 compute, f32 accumulate
        x = x_ref[...].astype(cdt)                 # (B, T)
        phi = phi_ref[...]                         # (T, Tout)

        # ---- order 0: S0 = x * phi (subsampled) --------------------------------
        out_ref[:, 0:Tout] = jnp.dot(x, phi, preferred_element_type=jnp.float32)

        # ---- order 1: all n1 band-pass filters in one wide matmul --------------
        y = jnp.dot(x, psi1_ref[...], preferred_element_type=jnp.float32)  # (B, 2*n1*T)
        yr = y[:, :n1 * T]
        yi = y[:, n1 * T:]
        u1 = jnp.sqrt(yr * yr + yi * yi)           # |x * psi1_i|, (B, n1*T) f32

        # Stack U1 as (n1*B, T) in VMEM scratch: raises the M dimension of the
        # downstream matmuls and keeps U1 on-chip (no HBM round trip).
        for i in range(n1):
            u1_ref[i * B:(i + 1) * B, :] = u1[:, i * T:(i + 1) * T]

        # S1 for all filters at once: (n1*B, T) @ (T, Tout)
        s1 = jnp.dot(u1_ref[...].astype(cdt), phi,
                     preferred_element_type=jnp.float32)     # (n1*B, Tout)
        for i in range(n1):
            c = 1 + i
            out_ref[:, c * Tout:(c + 1) * Tout] = s1[i * B:(i + 1) * B, :]

        # ---- order 2: grouped by i2; valid i1 set is the prefix {0..k-1} -------
        for (i2, k) in groups:
            lhs = u1_ref[0:k * B, :].astype(cdt)             # (k*B, T)
            y2 = jnp.dot(lhs, psi2_ref[i2],
                         preferred_element_type=jnp.float32)  # (k*B, 2T)
            y2r = y2[:, :T]
            y2i = y2[:, T:]
            u2 = jnp.sqrt(y2r * y2r + y2i * y2i)             # |U1 * psi2|
            s2 = jnp.dot(u2.astype(cdt), phi,
                         preferred_element_type=jnp.float32)  # (k*B, Tout)
            for i1 in range(k):
                c = pair_chan[(i1, i2)]                      # i1-major channel order
                out_ref[:, c * Tout:(c + 1) * Tout] = s2[i1 * B:(i1 + 1) * B, :]

    return kernel


# ----------------------------------------------------------------------------
# Wrapper (glue): one pallas_call + final reshape.
# ----------------------------------------------------------------------------
def scatter_forward(x, filters):
    psi1_cat = filters["psi1_cat"]
    psi2_cat = filters["psi2_cat"]
    phi_ds_T = filters["phi_ds_T"]
    meta = filters["meta"]

    B, T = x.shape
    n1 = meta["n1"]
    n_pairs = meta["n_pairs"]
    Tout = meta["Tout"]
    C = 1 + n1 + n_pairs

    kernel = _make_scatter_kernel(B, T, Tout, n1, meta["groups"],
                                  meta["pair_chan"])

    # Whole problem fits in VMEM (~1 MiB with bf16 filters): no grid needed,
    # Pallas maps each full array to a single VMEM block.
    out_flat = pl.pallas_call(
        kernel,
        out_shape=jax.ShapeDtypeStruct((B, C * Tout), jnp.float32),
        scratch_shapes=[pltpu.VMEM((n1 * B, T), jnp.float32)],
    )(x, psi1_cat, psi2_cat, phi_ds_T)

    # Channel order: [order0 | order1 | order2], as in kymatio's meta ordering.
    # torch.reshape(x, (B, 1, C, Tout)) in the PyTorch module:
    return out_flat.reshape(B, 1, C, Tout)


if __name__ == "__main__":
    J, Q, T = 3, 4, 128          # audio_length = 128
    B = 2
    filters = build_scattering_filters(J, Q, T)
    meta = filters["meta"]
    C = 1 + meta["n1"] + meta["n_pairs"]
    Tout = meta["Tout"]

    key = jax.random.PRNGKey(0)
    x = jax.random.normal(key, (B, T), dtype=jnp.float32)

    out = jax.jit(lambda a: scatter_forward(a, filters))(x)
    jax.block_until_ready(out)

    assert out.shape == (B, 1, C, Tout), out.shape
    assert out.dtype == jnp.float32
    assert bool(jnp.all(jnp.isfinite(out)))
    print("KERNEL_OK")
</pallas_src>

<mosaic_0001>
module attributes {stable_mosaic.version = 11 : i64} {
  func.func @kernel(%arg0: memref<2x128xf32, #tpu.memory_space<vmem>>, %arg1: memref<128x3072xbf16, #tpu.memory_space<vmem>>, %arg2: memref<3x128x256xbf16, #tpu.memory_space<vmem>>, %arg3: memref<128x16xbf16, #tpu.memory_space<vmem>>, %arg4: memref<2x400xf32, #tpu.memory_space<vmem>>, %arg5: memref<24x128xf32, #tpu.memory_space<vmem>>) attributes {dimension_semantics = [], scalar_prefetch = 0 : i64, scratch_operands = 1 : i64, tpu.core_type = #tpu.core_type<tc>} {
    %c0 = arith.constant 0 : index
    %c0_0 = arith.constant 0 : index
    %0 = vector.load %arg0[%c0, %c0_0] : memref<2x128xf32, #tpu.memory_space<vmem>>, vector<2x128xf32>
    %1 = arith.truncf %0 : vector<2x128xf32> to vector<2x128xbf16>
    %c0_1 = arith.constant 0 : index
    %c0_2 = arith.constant 0 : index
    %2 = vector.load %arg3[%c0_1, %c0_2] : memref<128x16xbf16, #tpu.memory_space<vmem>>, vector<128x16xbf16>
    %cst = arith.constant dense<0.000000e+00> : vector<2x16xf32>
    %3 = tpu.matmul %1, %2, %cst {dimension_numbers = #tpu.dot_dimension_numbers<[1], [0], [0], [1], [0, 0, 1, 1], [], []>} : vector<2x128xbf16>, vector<128x16xbf16>, vector<2x16xf32> -> vector<2x16xf32>
    %c0_3 = arith.constant 0 : index
    %c0_4 = arith.constant 0 : index
    %4 = vector.load %arg4[%c0_3, %c0_4] : memref<2x400xf32, #tpu.memory_space<vmem>>, vector<2x16xf32>
    tpu.vector_store %arg4[%c0_3, %c0_4], %3 {strides = array<i32>} : memref<2x400xf32, #tpu.memory_space<vmem>>, vector<2x16xf32>,
    %c0_5 = arith.constant 0 : index
    %c0_6 = arith.constant 0 : index
    %5 = vector.load %arg1[%c0_5, %c0_6] : memref<128x3072xbf16, #tpu.memory_space<vmem>>, vector<128x3072xbf16>
    %cst_7 = arith.constant dense<0.000000e+00> : vector<2x3072xf32>
    %6 = tpu.matmul %1, %5, %cst_7 {dimension_numbers = #tpu.dot_dimension_numbers<[1], [0], [0], [1], [0, 0, 1, 1], [], []>} : vector<2x128xbf16>, vector<128x3072xbf16>, vector<2x3072xf32> -> vector<2x3072xf32>
    %7 = vector.extract_strided_slice %6 {offsets = [0, 0], sizes = [2, 1536], strides = [1, 1]} : vector<2x3072xf32> to vector<2x1536xf32>
    %8 = vector.extract_strided_slice %6 {offsets = [0, 1536], sizes = [2, 1536], strides = [1, 1]} : vector<2x3072xf32> to vector<2x1536xf32>
    %9 = arith.mulf %7, %7 : vector<2x1536xf32>
    %10 = arith.mulf %8, %8 : vector<2x1536xf32>
    %11 = arith.addf %9, %10 : vector<2x1536xf32>
    %12 = math.sqrt %11 : vector<2x1536xf32>
    %13 = vector.extract_strided_slice %12 {offsets = [0, 0], sizes = [2, 128], strides = [1, 1]} : vector<2x1536xf32> to vector<2x128xf32>
    %c0_8 = arith.constant 0 : index
    %c0_9 = arith.constant 0 : index
    %14 = vector.load %arg5[%c0_8, %c0_9] : memref<24x128xf32, #tpu.memory_space<vmem>>, vector<2x128xf32>
    tpu.vector_store %arg5[%c0_8, %c0_9], %13 {strides = array<i32>} : memref<24x128xf32, #tpu.memory_space<vmem>>, vector<2x128xf32>,
    %15 = vector.extract_strided_slice %12 {offsets = [0, 128], sizes = [2, 128], strides = [1, 1]} : vector<2x1536xf32> to vector<2x128xf32>
    %c2 = arith.constant 2 : index
    %c0_10 = arith.constant 0 : index
    %16 = vector.load %arg5[%c2, %c0_10] : memref<24x128xf32, #tpu.memory_space<vmem>>, vector<2x128xf32>
    tpu.vector_store %arg5[%c2, %c0_10], %15 {strides = array<i32>} : memref<24x128xf32, #tpu.memory_space<vmem>>, vector<2x128xf32>,
    %17 = vector.extract_strided_slice %12 {offsets = [0, 256], sizes = [2, 128], strides = [1, 1]} : vector<2x1536xf32> to vector<2x128xf32>
    %c4 = arith.constant 4 : index
    %c0_11 = arith.constant 0 : index
    %18 = vector.load %arg5[%c4, %c0_11] : memref<24x128xf32, #tpu.memory_space<vmem>>, vector<2x128xf32>
    tpu.vector_store %arg5[%c4, %c0_11], %17 {strides = array<i32>} : memref<24x128xf32, #tpu.memory_space<vmem>>, vector<2x128xf32>,
    %19 = vector.extract_strided_slice %12 {offsets = [0, 384], sizes = [2, 128], strides = [1, 1]} : vector<2x1536xf32> to vector<2x128xf32>
    %c6 = arith.constant 6 : index
    %c0_12 = arith.constant 0 : index
    %20 = vector.load %arg5[%c6, %c0_12] : memref<24x128xf32, #tpu.memory_space<vmem>>, vector<2x128xf32>
    tpu.vector_store %arg5[%c6, %c0_12], %19 {strides = array<i32>} : memref<24x128xf32, #tpu.memory_space<vmem>>, vector<2x128xf32>,
    %21 = vector.extract_strided_slice %12 {offsets = [0, 512], sizes = [2, 128], strides = [1, 1]} : vector<2x1536xf32> to vector<2x128xf32>
    %c8 = arith.constant 8 : index
    %c0_13 = arith.constant 0 : index
    %22 = vector.load %arg5[%c8, %c0_13] : memref<24x128xf32, #tpu.memory_space<vmem>>, vector<2x128xf32>
    tpu.vector_store %arg5[%c8, %c0_13], %21 {strides = array<i32>} : memref<24x128xf32, #tpu.memory_space<vmem>>, vector<2x128xf32>,
    %23 = vector.extract_strided_slice %12 {offsets = [0, 640], sizes = [2, 128], strides = [1, 1]} : vector<2x1536xf32> to vector<2x128xf32>
    %c10 = arith.constant 10 : index
    %c0_14 = arith.constant 0 : index
    %24 = vector.load %arg5[%c10, %c0_14] : memref<24x128xf32, #tpu.memory_space<vmem>>, vector<2x128xf32>
    tpu.vector_store %arg5[%c10, %c0_14], %23 {strides = array<i32>} : memref<24x128xf32, #tpu.memory_space<vmem>>, vector<2x128xf32>,
    %25 = vector.extract_strided_slice %12 {offsets = [0, 768], sizes = [2, 128], strides = [1, 1]} : vector<2x1536xf32> to vector<2x128xf32>
    %c12 = arith.constant 12 : index
    %c0_15 = arith.constant 0 : index
    %26 = vector.load %arg5[%c12, %c0_15] : memref<24x128xf32, #tpu.memory_space<vmem>>, vector<2x128xf32>
    tpu.vector_store %arg5[%c12, %c0_15], %25 {strides = array<i32>} : memref<24x128xf32, #tpu.memory_space<vmem>>, vector<2x128xf32>,
    %27 = vector.extract_strided_slice %12 {offsets = [0, 896], sizes = [2, 128], strides = [1, 1]} : vector<2x1536xf32> to vector<2x128xf32>
    %c14 = arith.constant 14 : index
    %c0_16 = arith.constant 0 : index
    %28 = vector.load %arg5[%c14, %c0_16] : memref<24x128xf32, #tpu.memory_space<vmem>>, vector<2x128xf32>
    tpu.vector_store %arg5[%c14, %c0_16], %27 {strides = array<i32>} : memref<24x128xf32, #tpu.memory_space<vmem>>, vector<2x128xf32>,
    %29 = vector.extract_strided_slice %12 {offsets = [0, 1024], sizes = [2, 128], strides = [1, 1]} : vector<2x1536xf32> to vector<2x128xf32>
    %c16 = arith.constant 16 : index
    %c0_17 = arith.constant 0 : index
    %30 = vector.load %arg5[%c16, %c0_17] : memref<24x128xf32, #tpu.memory_space<vmem>>, vector<2x128xf32>
    tpu.vector_store %arg5[%c16, %c0_17], %29 {strides = array<i32>} : memref<24x128xf32, #tpu.memory_space<vmem>>, vector<2x128xf32>,
    %31 = vector.extract_strided_slice %12 {offsets = [0, 1152], sizes = [2, 128], strides = [1, 1]} : vector<2x1536xf32> to vector<2x128xf32>
    %c18 = arith.constant 18 : index
    %c0_18 = arith.constant 0 : index
    %32 = vector.load %arg5[%c18, %c0_18] : memref<24x128xf32, #tpu.memory_space<vmem>>, vector<2x128xf32>
    tpu.vector_store %arg5[%c18, %c0_18], %31 {strides = array<i32>} : memref<24x128xf32, #tpu.memory_space<vmem>>, vector<2x128xf32>,
    %33 = vector.extract_strided_slice %12 {offsets = [0, 1280], sizes = [2, 128], strides = [1, 1]} : vector<2x1536xf32> to vector<2x128xf32>
    %c20 = arith.constant 20 : index
    %c0_19 = arith.constant 0 : index
    %34 = vector.load %arg5[%c20, %c0_19] : memref<24x128xf32, #tpu.memory_space<vmem>>, vector<2x128xf32>
    tpu.vector_store %arg5[%c20, %c0_19], %33 {strides = array<i32>} : memref<24x128xf32, #tpu.memory_space<vmem>>, vector<2x128xf32>,
    %35 = vector.extract_strided_slice %12 {offsets = [0, 1408], sizes = [2, 128], strides = [1, 1]} : vector<2x1536xf32> to vector<2x128xf32>
    %c22 = arith.constant 22 : index
    %c0_20 = arith.constant 0 : index
    %36 = vector.load %arg5[%c22, %c0_20] : memref<24x128xf32, #tpu.memory_space<vmem>>, vector<2x128xf32>
    tpu.vector_store %arg5[%c22, %c0_20], %35 {strides = array<i32>} : memref<24x128xf32, #tpu.memory_space<vmem>>, vector<2x128xf32>,
    %c0_21 = arith.constant 0 : index
    %c0_22 = arith.constant 0 : index
    %37 = vector.load %arg5[%c0_21, %c0_22] : memref<24x128xf32, #tpu.memory_space<vmem>>, vector<24x128xf32>
    %38 = arith.truncf %37 : vector<24x128xf32> to vector<24x128xbf16>
    %cst_23 = arith.constant dense<0.000000e+00> : vector<24x16xf32>
    %39 = tpu.matmul %38, %2, %cst_23 {dimension_numbers = #tpu.dot_dimension_numbers<[1], [0], [0], [1], [0, 0, 1, 1], [], []>} : vector<24x128xbf16>, vector<128x16xbf16>, vector<24x16xf32> -> vector<24x16xf32>
    %40 = vector.extract_strided_slice %39 {offsets = [0, 0], sizes = [2, 16], strides = [1, 1]} : vector<24x16xf32> to vector<2x16xf32>
    %c0_24 = arith.constant 0 : index
    %c16_25 = arith.constant 16 : index
    %41 = vector.load %arg4[%c0_24, %c16_25] : memref<2x400xf32, #tpu.memory_space<vmem>>, vector<2x16xf32>
    tpu.vector_store %arg4[%c0_24, %c16_25], %40 {strides = array<i32>} : memref<2x400xf32, #tpu.memory_space<vmem>>, vector<2x16xf32>,
    %42 = vector.extract_strided_slice %39 {offsets = [2, 0], sizes = [2, 16], strides = [1, 1]} : vector<24x16xf32> to vector<2x16xf32>
    %c0_26 = arith.constant 0 : index
    %c32 = arith.constant 32 : index
    %43 = vector.load %arg4[%c0_26, %c32] : memref<2x400xf32, #tpu.memory_space<vmem>>, vector<2x16xf32>
    tpu.vector_store %arg4[%c0_26, %c32], %42 {strides = array<i32>} : memref<2x400xf32, #tpu.memory_space<vmem>>, vector<2x16xf32>,
    %44 = vector.extract_strided_slice %39 {offsets = [4, 0], sizes = [2, 16], strides = [1, 1]} : vector<24x16xf32> to vector<2x16xf32>
    %c0_27 = arith.constant 0 : index
    %c48 = arith.constant 48 : index
    %45 = vector.load %arg4[%c0_27, %c48] : memref<2x400xf32, #tpu.memory_space<vmem>>, vector<2x16xf32>
    tpu.vector_store %arg4[%c0_27, %c48], %44 {strides = array<i32>} : memref<2x400xf32, #tpu.memory_space<vmem>>, vector<2x16xf32>,
    %46 = vector.extract_strided_slice %39 {offsets = [6, 0], sizes = [2, 16], strides = [1, 1]} : vector<24x16xf32> to vector<2x16xf32>
    %c0_28 = arith.constant 0 : index
    %c64 = arith.constant 64 : index
    %47 = vector.load %arg4[%c0_28, %c64] : memref<2x400xf32, #tpu.memory_space<vmem>>, vector<2x16xf32>
    tpu.vector_store %arg4[%c0_28, %c64], %46 {strides = array<i32>} : memref<2x400xf32, #tpu.memory_space<vmem>>, vector<2x16xf32>,
    %48 = vector.extract_strided_slice %39 {offsets = [8, 0], sizes = [2, 16], strides = [1, 1]} : vector<24x16xf32> to vector<2x16xf32>
    %c0_29 = arith.constant 0 : index
    %c80 = arith.constant 80 : index
    %49 = vector.load %arg4[%c0_29, %c80] : memref<2x400xf32, #tpu.memory_space<vmem>>, vector<2x16xf32>
    tpu.vector_store %arg4[%c0_29, %c80], %48 {strides = array<i32>} : memref<2x400xf32, #tpu.memory_space<vmem>>, vector<2x16xf32>,
    %50 = vector.extract_strided_slice %39 {offsets = [10, 0], sizes = [2, 16], strides = [1, 1]} : vector<24x16xf32> to vector<2x16xf32>
    %c0_30 = arith.constant 0 : index
    %c96 = arith.constant 96 : index
    %51 = vector.load %arg4[%c0_30, %c96] : memref<2x400xf32, #tpu.memory_space<vmem>>, vector<2x16xf32>
    tpu.vector_store %arg4[%c0_30, %c96], %50 {strides = array<i32>} : memref<2x400xf32, #tpu.memory_space<vmem>>, vector<2x16xf32>,
    %52 = vector.extract_strided_slice %39 {offsets = [12, 0], sizes = [2, 16], strides = [1, 1]} : vector<24x16xf32> to vector<2x16xf32>
    %c0_31 = arith.constant 0 : index
    %c112 = arith.constant 112 : index
    %53 = vector.load %arg4[%c0_31, %c112] : memref<2x400xf32, #tpu.memory_space<vmem>>, vector<2x16xf32>
    tpu.vector_store %arg4[%c0_31, %c112], %52 {strides = array<i32>} : memref<2x400xf32, #tpu.memory_space<vmem>>, vector<2x16xf32>,
    %54 = vector.extract_strided_slice %39 {offsets = [14, 0], sizes = [2, 16], strides = [1, 1]} : vector<24x16xf32> to vector<2x16xf32>
    %c0_32 = arith.constant 0 : index
    %c128 = arith.constant 128 : index
    %55 = vector.load %arg4[%c0_32, %c128] : memref<2x400xf32, #tpu.memory_space<vmem>>, vector<2x16xf32>
    tpu.vector_store %arg4[%c0_32, %c128], %54 {strides = array<i32>} : memref<2x400xf32, #tpu.memory_space<vmem>>, vector<2x16xf32>,
    %56 = vector.extract_strided_slice %39 {offsets = [16, 0], sizes = [2, 16], strides = [1, 1]} : vector<24x16xf32> to vector<2x16xf32>
    %c0_33 = arith.constant 0 : index
    %c144 = arith.constant 144 : index
    %57 = vector.load %arg4[%c0_33, %c144] : memref<2x400xf32, #tpu.memory_space<vmem>>, vector<2x16xf32>
    tpu.vector_store %arg4[%c0_33, %c144], %56 {strides = array<i32>} : memref<2x400xf32, #tpu.memory_space<vmem>>, vector<2x16xf32>,
    %58 = vector.extract_strided_slice %39 {offsets = [18, 0], sizes = [2, 16], strides = [1, 1]} : vector<24x16xf32> to vector<2x16xf32>
    %c0_34 = arith.constant 0 : index
    %c160 = arith.constant 160 : index
    %59 = vector.load %arg4[%c0_34, %c160] : memref<2x400xf32, #tpu.memory_space<vmem>>, vector<2x16xf32>
    tpu.vector_store %arg4[%c0_34, %c160], %58 {strides = array<i32>} : memref<2x400xf32, #tpu.memory_space<vmem>>, vector<2x16xf32>,
    %60 = vector.extract_strided_slice %39 {offsets = [20, 0], sizes = [2, 16], strides = [1, 1]} : vector<24x16xf32> to vector<2x16xf32>
    %c0_35 = arith.constant 0 : index
    %c176 = arith.constant 176 : index
    %61 = vector.load %arg4[%c0_35, %c176] : memref<2x400xf32, #tpu.memory_space<vmem>>, vector<2x16xf32>
    tpu.vector_store %arg4[%c0_35, %c176], %60 {strides = array<i32>} : memref<2x400xf32, #tpu.memory_space<vmem>>, vector<2x16xf32>,
    %62 = vector.extract_strided_slice %39 {offsets = [22, 0], sizes = [2, 16], strides = [1, 1]} : vector<24x16xf32> to vector<2x16xf32>
    %c0_36 = arith.constant 0 : index
    %c192 = arith.constant 192 : index
    %63 = vector.load %arg4[%c0_36, %c192] : memref<2x400xf32, #tpu.memory_space<vmem>>, vector<2x16xf32>
    tpu.vector_store %arg4[%c0_36, %c192], %62 {strides = array<i32>} : memref<2x400xf32, #tpu.memory_space<vmem>>, vector<2x16xf32>,
    %c0_37 = arith.constant 0 : index
    %c0_38 = arith.constant 0 : index
    %64 = vector.load %arg5[%c0_37, %c0_38] : memref<24x128xf32, #tpu.memory_space<vmem>>, vector<8x128xf32>
    %65 = arith.truncf %64 : vector<8x128xf32> to vector<8x128xbf16>
    %c1 = arith.constant 1 : index
    %c0_39 = arith.constant 0 : index
    %c0_40 = arith.constant 0 : index
    %66 = vector.load %arg2[%c1, %c0_39, %c0_40] : memref<3x128x256xbf16, #tpu.memory_space<vmem>>, vector<1x128x256xbf16>
    %67 = vector.shape_cast %66 : vector<1x128x256xbf16> to vector<128x256xbf16>
    %cst_41 = arith.constant dense<0.000000e+00> : vector<8x256xf32>
    %68 = tpu.matmul %65, %67, %cst_41 {dimension_numbers = #tpu.dot_dimension_numbers<[1], [0], [0], [1], [0, 0, 1, 1], [], []>} : vector<8x128xbf16>, vector<128x256xbf16>, vector<8x256xf32> -> vector<8x256xf32>
    %69 = vector.extract_strided_slice %68 {offsets = [0, 0], sizes = [8, 128], strides = [1, 1]} : vector<8x256xf32> to vector<8x128xf32>
    %70 = vector.extract_strided_slice %68 {offsets = [0, 128], sizes = [8, 128], strides = [1, 1]} : vector<8x256xf32> to vector<8x128xf32>
    %71 = arith.mulf %69, %69 : vector<8x128xf32>
    %72 = arith.mulf %70, %70 : vector<8x128xf32>
    %73 = arith.addf %71, %72 : vector<8x128xf32>
    %74 = math.sqrt %73 : vector<8x128xf32>
    %75 = arith.truncf %74 : vector<8x128xf32> to vector<8x128xbf16>
    %cst_42 = arith.constant dense<0.000000e+00> : vector<8x16xf32>
    %76 = tpu.matmul %75, %2, %cst_42 {dimension_numbers = #tpu.dot_dimension_numbers<[1], [0], [0], [1], [0, 0, 1, 1], [], []>} : vector<8x128xbf16>, vector<128x16xbf16>, vector<8x16xf32> -> vector<8x16xf32>
    %77 = vector.extract_strided_slice %76 {offsets = [0, 0], sizes = [2, 16], strides = [1, 1]} : vector<8x16xf32> to vector<2x16xf32>
    %c0_43 = arith.constant 0 : index
    %c208 = arith.constant 208 : index
    %78 = vector.load %arg4[%c0_43, %c208] : memref<2x400xf32, #tpu.memory_space<vmem>>, vector<2x16xf32>
    tpu.vector_store %arg4[%c0_43, %c208], %77 {strides = array<i32>} : memref<2x400xf32, #tpu.memory_space<vmem>>, vector<2x16xf32>,
    %79 = vector.extract_strided_slice %76 {offsets = [2, 0], sizes = [2, 16], strides = [1, 1]} : vector<8x16xf32> to vector<2x16xf32>
    %c0_44 = arith.constant 0 : index
    %c240 = arith.constant 240 : index
    %80 = vector.load %arg4[%c0_44, %c240] : memref<2x400xf32, #tpu.memory_space<vmem>>, vector<2x16xf32>
    tpu.vector_store %arg4[%c0_44, %c240], %79 {strides = array<i32>} : memref<2x400xf32, #tpu.memory_space<vmem>>, vector<2x16xf32>,
    %81 = vector.extract_strided_slice %76 {offsets = [4, 0], sizes = [2, 16], strides = [1, 1]} : vector<8x16xf32> to vector<2x16xf32>
    %c0_45 = arith.constant 0 : index
    %c272 = arith.constant 272 : index
    %82 = vector.load %arg4[%c0_45, %c272] : memref<2x400xf32, #tpu.memory_space<vmem>>, vector<2x16xf32>
    tpu.vector_store %arg4[%c0_45, %c272], %81 {strides = array<i32>} : memref<2x400xf32, #tpu.memory_space<vmem>>, vector<2x16xf32>,
    %83 = vector.extract_strided_slice %76 {offsets = [6, 0], sizes = [2, 16], strides = [1, 1]} : vector<8x16xf32> to vector<2x16xf32>
    %c0_46 = arith.constant 0 : index
    %c304 = arith.constant 304 : index
    %84 = vector.load %arg4[%c0_46, %c304] : memref<2x400xf32, #tpu.memory_space<vmem>>, vector<2x16xf32>
    tpu.vector_store %arg4[%c0_46, %c304], %83 {strides = array<i32>} : memref<2x400xf32, #tpu.memory_space<vmem>>, vector<2x16xf32>,
    %c0_47 = arith.constant 0 : index
    %c0_48 = arith.constant 0 : index
    %85 = vector.load %arg5[%c0_47, %c0_48] : memref<24x128xf32, #tpu.memory_space<vmem>>, vector<16x128xf32>
    %86 = arith.truncf %85 : vector<16x128xf32> to vector<16x128xbf16>
    %c2_49 = arith.constant 2 : index
    %c0_50 = arith.constant 0 : index
    %c0_51 = arith.constant 0 : index
    %87 = vector.load %arg2[%c2_49, %c0_50, %c0_51] : memref<3x128x256xbf16, #tpu.memory_space<vmem>>, vector<1x128x256xbf16>
    %88 = vector.shape_cast %87 : vector<1x128x256xbf16> to vector<128x256xbf16>
    %cst_52 = arith.constant dense<0.000000e+00> : vector<16x256xf32>
    %89 = tpu.matmul %86, %88, %cst_52 {dimension_numbers = #tpu.dot_dimension_numbers<[1], [0], [0], [1], [0, 0, 1, 1], [], []>} : vector<16x128xbf16>, vector<128x256xbf16>, vector<16x256xf32> -> vector<16x256xf32>
    %90 = vector.extract_strided_slice %89 {offsets = [0, 0], sizes = [16, 128], strides = [1, 1]} : vector<16x256xf32> to vector<16x128xf32>
    %91 = vector.extract_strided_slice %89 {offsets = [0, 128], sizes = [16, 128], strides = [1, 1]} : vector<16x256xf32> to vector<16x128xf32>
    %92 = arith.mulf %90, %90 : vector<16x128xf32>
    %93 = arith.mulf %91, %91 : vector<16x128xf32>
    %94 = arith.addf %92, %93 : vector<16x128xf32>
    %95 = math.sqrt %94 : vector<16x128xf32>
    %96 = arith.truncf %95 : vector<16x128xf32> to vector<16x128xbf16>
    %cst_53 = arith.constant dense<0.000000e+00> : vector<16x16xf32>
    %97 = tpu.matmul %96, %2, %cst_53 {dimension_numbers = #tpu.dot_dimension_numbers<[1], [0], [0], [1], [0, 0, 1, 1], [], []>} : vector<16x128xbf16>, vector<128x16xbf16>, vector<16x16xf32> -> vector<16x16xf32>
    %98 = vector.extract_strided_slice %97 {offsets = [0, 0], sizes = [2, 16], strides = [1, 1]} : vector<16x16xf32> to vector<2x16xf32>
    %c0_54 = arith.constant 0 : index
    %c224 = arith.constant 224 : index
    %99 = vector.load %arg4[%c0_54, %c224] : memref<2x400xf32, #tpu.memory_space<vmem>>, vector<2x16xf32>
    tpu.vector_store %arg4[%c0_54, %c224], %98 {strides = array<i32>} : memref<2x400xf32, #tpu.memory_space<vmem>>, vector<2x16xf32>,
    %100 = vector.extract_strided_slice %97 {offsets = [2, 0], sizes = [2, 16], strides = [1, 1]} : vector<16x16xf32> to vector<2x16xf32>
    %c0_55 = arith.constant 0 : index
    %c256 = arith.constant 256 : index
    %101 = vector.load %arg4[%c0_55, %c256] : memref<2x400xf32, #tpu.memory_space<vmem>>, vector<2x16xf32>
    tpu.vector_store %arg4[%c0_55, %c256], %100 {strides = array<i32>} : memref<2x400xf32, #tpu.memory_space<vmem>>, vector<2x16xf32>,
    %102 = vector.extract_strided_slice %97 {offsets = [4, 0], sizes = [2, 16], strides = [1, 1]} : vector<16x16xf32> to vector<2x16xf32>
    %c0_56 = arith.constant 0 : index
    %c288 = arith.constant 288 : index
    %103 = vector.load %arg4[%c0_56, %c288] : memref<2x400xf32, #tpu.memory_space<vmem>>, vector<2x16xf32>
    tpu.vector_store %arg4[%c0_56, %c288], %102 {strides = array<i32>} : memref<2x400xf32, #tpu.memory_space<vmem>>, vector<2x16xf32>,
    %104 = vector.extract_strided_slice %97 {offsets = [6, 0], sizes = [2, 16], strides = [1, 1]} : vector<16x16xf32> to vector<2x16xf32>
    %c0_57 = arith.constant 0 : index
    %c320 = arith.constant 320 : index
    %105 = vector.load %arg4[%c0_57, %c320] : memref<2x400xf32, #tpu.memory_space<vmem>>, vector<2x16xf32>
    tpu.vector_store %arg4[%c0_57, %c320], %104 {strides = array<i32>} : memref<2x400xf32, #tpu.memory_space<vmem>>, vector<2x16xf32>,
    %106 = vector.extract_strided_slice %97 {offsets = [8, 0], sizes = [2, 16], strides = [1, 1]} : vector<16x16xf32> to vector<2x16xf32>
    %c0_58 = arith.constant 0 : index
    %c336 = arith.constant 336 : index
    %107 = vector.load %arg4[%c0_58, %c336] : memref<2x400xf32, #tpu.memory_space<vmem>>, vector<2x16xf32>
    tpu.vector_store %arg4[%c0_58, %c336], %106 {strides = array<i32>} : memref<2x400xf32, #tpu.memory_space<vmem>>, vector<2x16xf32>,
    %108 = vector.extract_strided_slice %97 {offsets = [10, 0], sizes = [2, 16], strides = [1, 1]} : vector<16x16xf32> to vector<2x16xf32>
    %c0_59 = arith.constant 0 : index
    %c352 = arith.constant 352 : index
    %109 = vector.load %arg4[%c0_59, %c352] : memref<2x400xf32, #tpu.memory_space<vmem>>, vector<2x16xf32>
    tpu.vector_store %arg4[%c0_59, %c352], %108 {strides = array<i32>} : memref<2x400xf32, #tpu.memory_space<vmem>>, vector<2x16xf32>,
    %110 = vector.extract_strided_slice %97 {offsets = [12, 0], sizes = [2, 16], strides = [1, 1]} : vector<16x16xf32> to vector<2x16xf32>
    %c0_60 = arith.constant 0 : index
    %c368 = arith.constant 368 : index
    %111 = vector.load %arg4[%c0_60, %c368] : memref<2x400xf32, #tpu.memory_space<vmem>>, vector<2x16xf32>
    tpu.vector_store %arg4[%c0_60, %c368], %110 {strides = array<i32>} : memref<2x400xf32, #tpu.memory_space<vmem>>, vector<2x16xf32>,
    %112 = vector.extract_strided_slice %97 {offsets = [14, 0], sizes = [2, 16], strides = [1, 1]} : vector<16x16xf32> to vector<2x16xf32>
    %c0_61 = arith.constant 0 : index
    %c384 = arith.constant 384 : index
    %113 = vector.load %arg4[%c0_61, %c384] : memref<2x400xf32, #tpu.memory_space<vmem>>, vector<2x16xf32>
    tpu.vector_store %arg4[%c0_61, %c384], %112 {strides = array<i32>} : memref<2x400xf32, #tpu.memory_space<vmem>>, vector<2x16xf32>,
    return
  }
}

</mosaic_0001>

<bundles_post_ra>
// kernel: _lambda_.1
= control target key start
LH: loop header
LB: loop body
LE: loop exit
PB: predicated region body
PF: predicated region fallthrough
CT: control target
= control target key end

     0   :  { %9 = vsyncpa [#allocation4], 0  ;;  %s4050_s0 = inlined_call_operand.hbm [shape: f32[2,128], index: 0, kind: input, shape index: {}]   ;;  %s4051_s1 = inlined_call_operand.hbm [shape: bf16[128,3072], index: 1, kind: input, shape index: {}]   ;;  %s4052_s2 = inlined_call_operand.hbm [shape: bf16[3,128,256], index: 2, kind: input, shape index: {}]   ;;  %s4053_s3 = inlined_call_operand.hbm [shape: bf16[128,16], index: 3, kind: input, shape index: {}]   ;;  %s4054_s4 = inlined_call_operand.vmem [shape: f32[2,400], index: 4, kind: output, shape index: {}]  }
   0x1   :  { %10 = vsyncpa [#allocation6], 0  ;;  %s27_s17 = sshll.u32 %s4051_s1, 4  ;;  %s28_s17 = int_to_ptr.hbm [resolvable:$true] %s27_s17 }
   0x2   :  { %11 = vsyncpa [#allocation9], 0  ;;  %s3644_s18 = smov [#allocation5]   ;;  %s17_s22 = sshll.u32 %s4050_s0, 4  ;;  %s18_s22 = int_to_ptr.hbm [resolvable:$true] %s17_s22 }
   0x3   :  { %s29_s19 = sshll.u32 %s3644_s18, 4  ;;  %s3645_s23 = smov 1536   ;;  %s30_s19 = int_to_ptr.vmem [resolvable:$true] %s29_s19 }
   0x4   :  { %s3646_s24 = smov 96   ;;  %s3647_s25 = smov [#allocation3]  }
   0x5   :  { %35 = dma.hbm_to_vmem [thread:$0]  %s28_s17, 24576, %s30_s19, [#allocation6], %s3645_s23, %s3645_s23, %s3646_s24  }
   0x6   :  { %s19_s26 = sshll.u32 %s3647_s25, 4  ;;  %s40_s1 = sshll.u32 %s4052_s2, 4  ;;  %s20_s26 = int_to_ptr.vmem [resolvable:$true] %s19_s26  ;;  %s41_s1 = int_to_ptr.hbm [resolvable:$true] %s40_s1 }
   0x7   :  { %22 = dma.hbm_to_vmem [thread:$0]  %s18_s22, 32, %s20_s26, [#allocation4]  }
   0x8   :  { %s3648_s29 = smov [#allocation7]   ;;  %s53_s0 = sshll.u32 %s4053_s3, 4  ;;  %s54_s0 = int_to_ptr.hbm [resolvable:$true] %s53_s0 }
   0x9   :  { %s42_s30 = sshll.u32 %s3648_s29, 4  ;;  %s3649_s7 = smov 128   ;;  %s43_s30 = int_to_ptr.vmem [resolvable:$true] %s42_s30 }
   0xa   :  { %s3650_s8 = smov 8   ;;  %s3651_s9 = smov [#allocation8]  }
   0xb   :  { %48 = dma.hbm_to_vmem [thread:$0]  %s41_s1, 6144, %s43_s30, [#allocation6], %s3649_s7, %s3649_s7, %s3650_s8  }
   0xc   :  { %s55_s10 = sshll.u32 %s3651_s9, 4  ;;  %s3652_s11 = smov 64   ;;  %s56_s10 = int_to_ptr.vmem [resolvable:$true] %s55_s10 }
   0xd   :  { %s3653_s12 = smov 4  }
   0xe   :  { %61 = dma.hbm_to_vmem [thread:$0]  %s54_s0, 1024, %s56_s10, [#allocation9], %s3652_s11, %s3652_s11, %s3653_s12  }
   0xf   :  { %3638 = dma.done.wait [#allocation4], 32  }
  0x10   :  { %3639 = vsyncadd [#allocation4], 4294967264 }
  0x11   :  { %3640 = dma.done.wait [#allocation6], 30720  }
  0x12   :  { %3641 = vsyncadd [#allocation6], 4294936576 }
  0x13   :  { %3642 = dma.done.wait [#allocation9], 1024  }
  0x14   :  { %3643 = vsyncadd [#allocation9], 4294966272  ;;  %v3264_v0 = vld [vmem:[#allocation8 + $0x38] sm:$0xff]  ;;  %v3035_v1 = vld [vmem:[#allocation5 + $0x540] sm:$0xf]  ;;  %vm157_vm0 = vcmask 123904  }
  0x15   :  { %v3445_v2 = vld [vmem:[#allocation5 + $0x59c] sm:$0xf0]  ;;  %v3433_v4 = vld [vmem:[#allocation5 + $0x544] sm:$0xf]  ;;  %v3043_v6 = vld [vmem:[#allocation5 + $0x548] sm:$0xf]  ;;  %144 = vmatpush.bf16.msra.mxu0 %v3264_v0 }
  0x16   :  { %v3036_v3 = vor.u32 %v3445_v2, %v3035_v1  ;;  %v3037_v5 = vld [vmem:[#allocation5 + $0x5a0] sm:$0xf0]  ;;  %v3446_v8 = vld [vmem:[#allocation5 + $0x5a4] sm:$0xf0]  ;;  %v3263_v9 = vld [vmem:[#allocation8 + $0x30] sm:$0xff]  ;;  %s3654_s13 = smov 16  }
  0x17   :  { %v3040_v7 = vor.u32 %v3433_v4, %v3037_v5  ;;  %v2939_v10 = vld [vmem:[#allocation5 + $0x480] sm:$0xf]  ;;  %v3044_v11 = vor.u32 %v3446_v8, %v3043_v6  ;;  %v3409_v13 = vld [vmem:[#allocation5 + $0x484] sm:$0xf]  ;;  %v2947_v17 = vld [vmem:[#allocation5 + $0x488] sm:$0xf] }
  0x18   :  { %1311 = vmatpush.bf16.msra.mxu1 %v3036_v3  ;;  %v3421_v12 = vld [vmem:[#allocation5 + $0x4dc] sm:$0xf0]  ;;  %v2941_v14 = vld [vmem:[#allocation5 + $0x4e0] sm:$0xf0]  ;;  %v3422_v18 = vld [vmem:[#allocation5 + $0x4e4] sm:$0xf0] }
  0x19   :  { %1324 = vmatpush.bf16.msra.mxu2 %v3040_v7  ;;  %v2940_v15 = vor.u32 %v3421_v12, %v2939_v10  ;;  %v2944_v16 = vor.u32 %v3409_v13, %v2941_v14  ;;  %v3262_v19 = vld [vmem:[#allocation8 + $0x28] sm:$0xff]  ;;  %1337 = vmatpush.bf16.msra.mxu3 %v3044_v11  ;;  %v2948_v20 = vor.u32 %v3422_v18, %v2947_v17  ;;  %v2843_v21 = vld [vmem:[#allocation5 + $0x3c0] sm:$0xf]  ;;  %v3385_v23 = vld [vmem:[#allocation5 + $0x3c4] sm:$0xf]  ;;  %s3655_s14 = smov 32  }
  0x1a   :  { %v3397_v22 = vld [vmem:[#allocation5 + $0x41c] sm:$0xf0]  ;;  %145 = vmatpush.bf16.msra.mxu0 %v3263_v9  ;;  %v2845_v24 = vld [vmem:[#allocation5 + $0x420] sm:$0xf0]  ;;  %v2851_v25 = vld [vmem:[#allocation5 + $0x3c8] sm:$0xf] }
  0x1b   :  { %v3398_v26 = vld [vmem:[#allocation5 + $0x424] sm:$0xf0]  ;;  %v2844_v27 = vor.u32 %v3397_v22, %v2843_v21  ;;  %v2848_v28 = vor.u32 %v3385_v23, %v2845_v24  ;;  %v2747_v29 = vld [vmem:[#allocation5 + $0x300] sm:$0xf]  ;;  %v3361_v32 = vld [vmem:[#allocation5 + $0x304] sm:$0xf] }
  0x1c   :  { %1312 = vmatpush.bf16.msra.mxu1 %v2940_v15  ;;  %v3373_v30 = vld [vmem:[#allocation5 + $0x35c] sm:$0xf0]  ;;  %v2852_v31 = vor.u32 %v3398_v26, %v2851_v25  ;;  %v2749_v33 = vld [vmem:[#allocation5 + $0x360] sm:$0xf0]  ;;  %v2755_v35 = vld [vmem:[#allocation5 + $0x308] sm:$0xf] }
  0x1d   :  { %1325 = vmatpush.bf16.msra.mxu2 %v2944_v16  ;;  %1338 = vmatpush.bf16.msra.mxu3 %v2948_v20  ;;  %v3261_v34 = vld [vmem:[#allocation8 + $0x20] sm:$0xff]  ;;  %v3374_v36 = vld [vmem:[#allocation5 + $0x364] sm:$0xf0]  ;;  %v2748_v37 = vor.u32 %v3373_v30, %v2747_v29  ;;  %v2752_v38 = vor.u32 %v3361_v32, %v2749_v33  ;;  %v3260_v44 = vld [vmem:[#allocation8 + $0x18] sm:$0xff]  ;;  %s3656_s15 = smov 80   ;;  %s3657_s16 = smov 48  }
  0x1e   :  { %146 = vmatpush.bf16.msra.mxu0 %v3262_v19  ;;  %v2651_v39 = vld [vmem:[#allocation5 + $0x240] sm:$0xf]  ;;  %v2756_v41 = vor.u32 %v3374_v36, %v2755_v35  ;;  %v3337_v42 = vld [vmem:[#allocation5 + $0x244] sm:$0xf]  ;;  %v2659_v45 = vld [vmem:[#allocation5 + $0x248] sm:$0xf] }
  0x1f   :  { %v3349_v40 = vld [vmem:[#allocation5 + $0x29c] sm:$0xf0]  ;;  %v2653_v43 = vld [vmem:[#allocation5 + $0x2a0] sm:$0xf0]  ;;  %v3350_v46 = vld [vmem:[#allocation5 + $0x2a4] sm:$0xf0] }
  0x20   :  { %1313 = vmatpush.bf16.msra.mxu1 %v2844_v27  ;;  %v2652_v47 = vor.u32 %v3349_v40, %v2651_v39  ;;  %v2656_v48 = vor.u32 %v3337_v42, %v2653_v43  ;;  %v2555_v49 = vld [vmem:[#allocation5 + $0x180] sm:$0xf]  ;;  %v2660_v51 = vor.u32 %v3350_v46, %v2659_v45  ;;  %v3313_v52 = vld [vmem:[#allocation5 + $0x184] sm:$0xf]  ;;  %v3259_v54 = vld [vmem:[#allocation8 + $0x10] sm:$0xff]  ;;  %s3658_s26 = smov 112  }
  0x21   :  { %1326 = vmatpush.bf16.msra.mxu2 %v2848_v28  ;;  %1339 = vmatpush.bf16.msra.mxu3 %v2852_v31  ;;  %v3325_v50 = vld [vmem:[#allocation5 + $0x1dc] sm:$0xf0]  ;;  %v2557_v53 = vld [vmem:[#allocation5 + $0x1e0] sm:$0xf0]  ;;  %v2563_v55 = vld [vmem:[#allocation5 + $0x188] sm:$0xf] }
  0x22   :  { %147 = vmatpush.bf16.msra.mxu0 %v3261_v34  ;;  %v3326_v56 = vld [vmem:[#allocation5 + $0x1e4] sm:$0xf0]  ;;  %v2556_v57 = vor.u32 %v3325_v50, %v2555_v49  ;;  %v2560_v58 = vor.u32 %v3313_v52, %v2557_v53  ;;  %v2459_v59 = vld [vmem:[#allocation5 + $0xc0] sm:$0xf]  ;;  %v3289_v62 = vld [vmem:[#allocation5 + $0xc4] sm:$0xf] }
  0x23   :  { %v3301_v60 = vld [vmem:[#allocation5 + $0x11c] sm:$0xf0]  ;;  %v2564_v61 = vor.u32 %v3326_v56, %v2563_v55  ;;  %v2461_v63 = vld [vmem:[#allocation5 + $0x120] sm:$0xf0]  ;;  %v3258_v0 = vld [vmem:[#allocation8 + $0x8] sm:$0xff] }
  0x24   :  { %1314 = vmatpush.bf16.msra.mxu1 %v2748_v37  ;;  %v2467_v1 = vld [vmem:[#allocation5 + $0xc8] sm:$0xf]  ;;  %v2460_v3 = vor.u32 %v3301_v60, %v2459_v59  ;;  %v2363_v4 = vld [vmem:[#allocation5] sm:$0xf]  ;;  %v3265_v6 = vld [vmem:[#allocation5 + $0x4] sm:$0xf]  ;;  %v2464_v7 = vor.u32 %v3289_v62, %v2461_v63 }
  0x25   :  { %1327 = vmatpush.bf16.msra.mxu2 %v2752_v38  ;;  %1340 = vmatpush.bf16.msra.mxu3 %v2756_v41  ;;  %v3302_v2 = vld [vmem:[#allocation5 + $0x124] sm:$0xf0]  ;;  %v3277_v5 = vld [vmem:[#allocation5 + $0x5c] sm:$0xf0]  ;;  %v2365_v9 = vld [vmem:[#allocation5 + $0x60] sm:$0xf0] }
  0x26   :  { %148 = vmatpush.bf16.msra.mxu0 %v3260_v44  ;;  %v3257_v8 = vld [vmem:[#allocation8] sm:$0xff]  ;;  %v3434_v10 = vld [vmem:[#allocation5 + $0x54c] sm:$0xf]  ;;  %v2468_v12 = vor.u32 %v3302_v2, %v2467_v1  ;;  %v2371_v13 = vld [vmem:[#allocation5 + $0x8] sm:$0xf]  ;;  %v2364_v19 = vor.u32 %v3277_v5, %v2363_v4  ;;  %v2368_v23 = vor.u32 %v3265_v6, %v2365_v9 }
  0x27   :  { %v3045_v11 = vld [vmem:[#allocation5 + $0x5a8] sm:$0xf0]  ;;  %v3051_v14 = vld [vmem:[#allocation5 + $0x550] sm:$0xf]  ;;  %v3278_v16 = vld [vmem:[#allocation5 + $0x64] sm:$0xf0] }
  0x28   :  { %1315 = vmatpush.bf16.msra.mxu1 %v2652_v47  ;;  %v3447_v15 = vld [vmem:[#allocation5 + $0x5ac] sm:$0xf0]  ;;  %v3435_v17 = vld [vmem:[#allocation5 + $0x554] sm:$0xf]  ;;  %v3048_v20 = vor.u32 %v3434_v10, %v3045_v11  ;;  %v3059_v21 = vld [vmem:[#allocation5 + $0x558] sm:$0xf]  ;;  %v2372_v27 = vor.u32 %v3278_v16, %v2371_v13 }
  0x29   :  { %1328 = vmatpush.bf16.msra.mxu2 %v2656_v48  ;;  %1341 = vmatpush.bf16.msra.mxu3 %v2660_v51  ;;  %v3053_v18 = vld [vmem:[#allocation5 + $0x5b0] sm:$0xf0]  ;;  %v3448_v22 = vld [vmem:[#allocation5 + $0x5b4] sm:$0xf0]  ;;  %v3052_v24 = vor.u32 %v3447_v15, %v3051_v14  ;;  %v3410_v25 = vld [vmem:[#allocation5 + $0x48c] sm:$0xf] }
  0x2a   :  { %149 = vmatpush.bf16.msra.mxu0 %v3259_v54  ;;  %v2949_v26 = vld [vmem:[#allocation5 + $0x4e8] sm:$0xf0]  ;;  %v3056_v28 = vor.u32 %v3435_v17, %v3053_v18  ;;  %v2955_v29 = vld [vmem:[#allocation5 + $0x490] sm:$0xf]  ;;  %v3060_v31 = vor.u32 %v3448_v22, %v3059_v21  ;;  %v3411_v32 = vld [vmem:[#allocation5 + $0x494] sm:$0xf] }
  0x2b   :  { %v3423_v30 = vld [vmem:[#allocation5 + $0x4ec] sm:$0xf0]  ;;  %v2957_v33 = vld [vmem:[#allocation5 + $0x4f0] sm:$0xf0]  ;;  %v2952_v34 = vor.u32 %v3410_v25, %v2949_v26  ;;  %v2963_v35 = vld [vmem:[#allocation5 + $0x498] sm:$0xf] }
  0x2c   :  { %1316 = vmatpush.bf16.msra.mxu1 %v2556_v57  ;;  %v3424_v36 = vld [vmem:[#allocation5 + $0x4f4] sm:$0xf0]  ;;  %v2956_v37 = vor.u32 %v3423_v30, %v2955_v29  ;;  %v3386_v38 = vld [vmem:[#allocation5 + $0x3cc] sm:$0xf]  ;;  %v2960_v40 = vor.u32 %v3411_v32, %v2957_v33  ;;  %v2859_v41 = vld [vmem:[#allocation5 + $0x3d0] sm:$0xf] }
  0x2d   :  { %1329 = vmatpush.bf16.msra.mxu2 %v2560_v58  ;;  %1342 = vmatpush.bf16.msra.mxu3 %v2564_v61  ;;  %v2853_v39 = vld [vmem:[#allocation5 + $0x428] sm:$0xf0]  ;;  %v3399_v42 = vld [vmem:[#allocation5 + $0x42c] sm:$0xf0]  ;;  %v2964_v43 = vor.u32 %v3424_v36, %v2963_v35  ;;  %v3387_v44 = vld [vmem:[#allocation5 + $0x3d4] sm:$0xf] }
  0x2e   :  { %150 = vmatpush.bf16.msra.mxu0 %v3258_v0  ;;  %v2861_v45 = vld [vmem:[#allocation5 + $0x430] sm:$0xf0]  ;;  %v78_v46 = vld [vmem:[#allocation3] sm:$0x3]  ;;  %v2856_v47 = vor.u32 %v3386_v38, %v2853_v39  ;;  %v2867_v48 = vld [vmem:[#allocation5 + $0x3d8] sm:$0xf]  ;;  %v2860_v51 = vor.u32 %v3399_v42, %v2859_v41 }
  0x2f   :  { %v3400_v49 = vld [vmem:[#allocation5 + $0x434] sm:$0xf0]  ;;  %v3699_v50 = vpack.c.bf16 %v78_v46, %v78_v46  ;;  %v3362_v52 = vld [vmem:[#allocation5 + $0x30c] sm:$0xf]  ;;  %v2864_v54 = vor.u32 %v3387_v44, %v2861_v45  ;;  %v2763_v55 = vld [vmem:[#allocation5 + $0x310] sm:$0xf] }
  0x30   :  { %1317 = vmatpush.bf16.msra.mxu1 %v2460_v3  ;;  %v2757_v53 = vld [vmem:[#allocation5 + $0x368] sm:$0xf0]  ;;  %v3375_v56 = vld [vmem:[#allocation5 + $0x36c] sm:$0xf0]  ;;  %v2868_v57 = vor.u32 %v3400_v49, %v2867_v48  ;;  %v3363_v58 = vld [vmem:[#allocation5 + $0x314] sm:$0xf] }
  0x31   :  { %1330 = vmatpush.bf16.msra.mxu2 %v2464_v7  ;;  %1343 = vmatpush.bf16.msra.mxu3 %v2468_v12  ;;  %v2765_v59 = vld [vmem:[#allocation5 + $0x370] sm:$0xf0]  ;;  %v2760_v60 = vor.u32 %v3362_v52, %v2757_v53  ;;  %v2771_v61 = vld [vmem:[#allocation5 + $0x318] sm:$0xf]  ;;  %v2764_v63 = vor.u32 %v3375_v56, %v2763_v55  ;;  %v3338_v0 = vld [vmem:[#allocation5 + $0x24c] sm:$0xf] }
  0x32   :  { %151 = vmatpush.bf16.msra.mxu0 %v3257_v8  ;;  %v3376_v62 = vld [vmem:[#allocation5 + $0x374] sm:$0xf0]  ;;  %v2661_v1 = vld [vmem:[#allocation5 + $0x2a8] sm:$0xf0]  ;;  %v2768_v2 = vor.u32 %v3363_v58, %v2765_v59  ;;  %v2667_v3 = vld [vmem:[#allocation5 + $0x250] sm:$0xf] }
  0x33   :  { %v3351_v4 = vld [vmem:[#allocation5 + $0x2ac] sm:$0xf0]  ;;  %v2772_v5 = vor.u32 %v3376_v62, %v2771_v61  ;;  %v3339_v6 = vld [vmem:[#allocation5 + $0x254] sm:$0xf]  ;;  %v2664_v8 = vor.u32 %v3338_v0, %v2661_v1  ;;  %v2675_v9 = vld [vmem:[#allocation5 + $0x258] sm:$0xf] }
  0x34   :  { %1318 = vmatpush.bf16.msra.mxu1 %v2364_v19  ;;  %v2669_v7 = vld [vmem:[#allocation5 + $0x2b0] sm:$0xf0]  ;;  %v3352_v10 = vld [vmem:[#allocation5 + $0x2b4] sm:$0xf0]  ;;  %v2668_v11 = vor.u32 %v3351_v4, %v2667_v3  ;;  %v3314_v12 = vld [vmem:[#allocation5 + $0x18c] sm:$0xf] }
  0x35   :  { %1331 = vmatpush.bf16.msra.mxu2 %v2368_v23  ;;  %1344 = vmatpush.bf16.msra.mxu3 %v2372_v27  ;;  %v2565_v13 = vld [vmem:[#allocation5 + $0x1e8] sm:$0xf0]  ;;  %v2672_v14 = vor.u32 %v3339_v6, %v2669_v7  ;;  %v2571_v15 = vld [vmem:[#allocation5 + $0x190] sm:$0xf]  ;;  %v2676_v17 = vor.u32 %v3352_v10, %v2675_v9  ;;  %v3315_v18 = vld [vmem:[#allocation5 + $0x194] sm:$0xf] }
  0x36   :  { %1350 = vmatpush.bf16.msrb.mxu0 %v3048_v20  ;;  %v3327_v16 = vld [vmem:[#allocation5 + $0x1ec] sm:$0xf0]  ;;  %v2573_v19 = vld [vmem:[#allocation5 + $0x1f0] sm:$0xf0]  ;;  %v2568_v20 = vor.u32 %v3314_v12, %v2565_v13  ;;  %v2579_v21 = vld [vmem:[#allocation5 + $0x198] sm:$0xf] }
  0x37   :  { %152 = vmatmul.bf16.vlgmr.msra.gmra.mxu0 %v3699_v50  ;;  %1319 = vmatmul.bf16.vlgmr.msra.gmra.mxu1 %v3699_v50  ;;  %v3328_v22 = vld [vmem:[#allocation5 + $0x1f4] sm:$0xf0]  ;;  %v2572_v23 = vor.u32 %v3327_v16, %v2571_v15  ;;  %v2469_v25 = vld [vmem:[#allocation5 + $0x128] sm:$0xf0]  ;;  %v2576_v26 = vor.u32 %v3315_v18, %v2573_v19  ;;  %v2475_v27 = vld [vmem:[#allocation5 + $0xd0] sm:$0xf] }
  0x38   :  { %1363 = vmatpush.bf16.msrb.mxu1 %v3052_v24  ;;  %1332 = vmatmul.bf16.vlgmr.msra.gmra.mxu2 %v3699_v50  ;;  %v3290_v24 = vld [vmem:[#allocation5 + $0xcc] sm:$0xf]  ;;  %v2580_v29 = vor.u32 %v3328_v22, %v2579_v21  ;;  %v3291_v30 = vld [vmem:[#allocation5 + $0xd4] sm:$0xf]  ;;  %v2483_v32 = vld [vmem:[#allocation5 + $0xd8] sm:$0xf] }
  0x39   :  { %1376 = vmatpush.bf16.msrb.mxu2 %v3056_v28  ;;  %1389 = vmatpush.bf16.msrb.mxu3 %v3060_v31  ;;  %v3303_v28 = vld [vmem:[#allocation5 + $0x12c] sm:$0xf0]  ;;  %v2477_v31 = vld [vmem:[#allocation5 + $0x130] sm:$0xf0]  ;;  %v2472_v33 = vor.u32 %v3290_v24, %v2469_v25  ;;  %v3266_v35 = vld [vmem:[#allocation5 + $0xc] sm:$0xf] }
  0x3a   :  { %1351 = vmatpush.bf16.msrb.mxu0 %v2952_v34  ;;  %1345 = vmatmul.bf16.vlgmr.msra.gmra.mxu3 %v3699_v50  ;;  %v3304_v34 = vld [vmem:[#allocation5 + $0x134] sm:$0xf0]  ;;  %v2373_v36 = vld [vmem:[#allocation5 + $0x68] sm:$0xf0]  ;;  %v2379_v38 = vld [vmem:[#allocation5 + $0x10] sm:$0xf]  ;;  %v2480_v41 = vor.u32 %v3291_v30, %v2477_v31 }
  0x3b   :  { %v3279_v39 = vld [vmem:[#allocation5 + $0x6c] sm:$0xf0]  ;;  %v2381_v42 = vld [vmem:[#allocation5 + $0x70] sm:$0xf0]  ;;  %v3061_v44 = vld [vmem:[#allocation5 + $0x5b8] sm:$0xf0]  ;;  %v2484_v45 = vor.u32 %v3304_v34, %v2483_v32  ;;  %v2376_v49 = vor.u32 %v3266_v35, %v2373_v36 }
  0x3c   :  { %1364 = vmatpush.bf16.msrb.mxu1 %v2956_v37  ;;  %v2476_v37 = vor.u32 %v3303_v28, %v2475_v27  ;;  %v2387_v46 = vld [vmem:[#allocation5 + $0x18] sm:$0xf]  ;;  %v3449_v48 = vld [vmem:[#allocation5 + $0x5bc] sm:$0xf0]  ;;  %v3437_v52 = vld [vmem:[#allocation5 + $0x564] sm:$0xf] }
  0x3d   :  { %1377 = vmatpush.bf16.msrb.mxu2 %v2960_v40  ;;  %1390 = vmatpush.bf16.msrb.mxu3 %v2964_v43  ;;  %v3267_v40 = vld [vmem:[#allocation5 + $0x14] sm:$0xf]  ;;  %v3436_v43 = vld [vmem:[#allocation5 + $0x55c] sm:$0xf]  ;;  %v3069_v53 = vld [vmem:[#allocation5 + $0x5c0] sm:$0xf0] }
  0x3e   :  { %1352 = vmatpush.bf16.msrb.mxu0 %v2856_v47  ;;  %v3067_v47 = vld [vmem:[#allocation5 + $0x560] sm:$0xf]  ;;  %v3064_v55 = vor.u32 %v3436_v43, %v3061_v44  ;;  %v3075_v56 = vld [vmem:[#allocation5 + $0x568] sm:$0xf]  ;;  %v2384_v58 = vor.u32 %v3267_v40, %v2381_v42  ;;  %v2965_v61 = vld [vmem:[#allocation5 + $0x4f8] sm:$0xf0] }
  0x3f   :  { %v3068_v59 = vor.u32 %v3449_v48, %v3067_v47  ;;  %v2971_v0 = vld [vmem:[#allocation5 + $0x4a0] sm:$0xf]  ;;  %v3413_v3 = vld [vmem:[#allocation5 + $0x4a4] sm:$0xf]  ;;  %v2979_v6 = vld [vmem:[#allocation5 + $0x4a8] sm:$0xf] }
  0x40   :  { %1365 = vmatpush.bf16.msrb.mxu1 %v2860_v51  ;;  %v3280_v51 = vld [vmem:[#allocation5 + $0x74] sm:$0xf0]  ;;  %v3425_v1 = vld [vmem:[#allocation5 + $0x4fc] sm:$0xf0]  ;;  %v2973_v4 = vld [vmem:[#allocation5 + $0x500] sm:$0xf0] }
  0x41   :  { %1378 = vmatpush.bf16.msrb.mxu2 %v2864_v54  ;;  %1391 = vmatpush.bf16.msrb.mxu3 %v2868_v57  ;;  %v2380_v54 = vor.u32 %v3279_v39, %v2379_v38  ;;  %v3450_v57 = vld [vmem:[#allocation5 + $0x5c4] sm:$0xf0]  ;;  %v2388_v62 = vor.u32 %v3280_v51, %v2387_v46  ;;  %v3388_v9 = vld [vmem:[#allocation5 + $0x3dc] sm:$0xf]  ;;  %v2875_v12 = vld [vmem:[#allocation5 + $0x3e0] sm:$0xf] }
  0x42   :  { %1353 = vmatpush.bf16.msrb.mxu0 %v2760_v60  ;;  %v3412_v60 = vld [vmem:[#allocation5 + $0x49c] sm:$0xf]  ;;  %v3426_v7 = vld [vmem:[#allocation5 + $0x504] sm:$0xf0]  ;;  %v3401_v13 = vld [vmem:[#allocation5 + $0x43c] sm:$0xf0] }
  0x43   :  { %v2869_v10 = vld [vmem:[#allocation5 + $0x438] sm:$0xf0]  ;;  %v3389_v15 = vld [vmem:[#allocation5 + $0x3e4] sm:$0xf]  ;;  %v2883_v18 = vld [vmem:[#allocation5 + $0x3e8] sm:$0xf] }
  0x44   :  { %1366 = vmatpush.bf16.msrb.mxu1 %v2764_v63  ;;  %v3072_v63 = vor.u32 %v3437_v52, %v3069_v53  ;;  %v2877_v16 = vld [vmem:[#allocation5 + $0x440] sm:$0xf0]  ;;  %v3402_v19 = vld [vmem:[#allocation5 + $0x444] sm:$0xf0]  ;;  %v3364_v21 = vld [vmem:[#allocation5 + $0x31c] sm:$0xf] }
  0x45   :  { %1379 = vmatpush.bf16.msrb.mxu2 %v2768_v2  ;;  %1392 = vmatpush.bf16.msrb.mxu3 %v2772_v5  ;;  %v3076_v2 = vor.u32 %v3450_v57, %v3075_v56  ;;  %v2968_v5 = vor.u32 %v3412_v60, %v2965_v61  ;;  %v2773_v22 = vld [vmem:[#allocation5 + $0x378] sm:$0xf0]  ;;  %v2779_v24 = vld [vmem:[#allocation5 + $0x320] sm:$0xf]  ;;  %v3365_v27 = vld [vmem:[#allocation5 + $0x324] sm:$0xf] }
  0x46   :  { %1354 = vmatpush.bf16.msrb.mxu0 %v2664_v8  ;;  %v2972_v8 = vor.u32 %v3425_v1, %v2971_v0  ;;  %v3377_v25 = vld [vmem:[#allocation5 + $0x37c] sm:$0xf0]  ;;  %v2781_v28 = vld [vmem:[#allocation5 + $0x380] sm:$0xf0]  ;;  %v2787_v30 = vld [vmem:[#allocation5 + $0x328] sm:$0xf] }
  0x47   :  { %v3378_v31 = vld [vmem:[#allocation5 + $0x384] sm:$0xf0]  ;;  %v2780_v32 = vor.u32 %v3377_v25, %v2779_v24  ;;  %v2677_v34 = vld [vmem:[#allocation5 + $0x2b8] sm:$0xf0]  ;;  %v2784_v35 = vor.u32 %v3365_v27, %v2781_v28  ;;  %v2683_v36 = vld [vmem:[#allocation5 + $0x260] sm:$0xf] }
  0x48   :  { %1367 = vmatpush.bf16.msrb.mxu1 %v2668_v11  ;;  %v2976_v11 = vor.u32 %v3413_v3, %v2973_v4  ;;  %v2788_v38 = vor.u32 %v3378_v31, %v2787_v30  ;;  %v3341_v39 = vld [vmem:[#allocation5 + $0x264] sm:$0xf]  ;;  %v2691_v42 = vld [vmem:[#allocation5 + $0x268] sm:$0xf]  ;;  %v2581_v46 = vld [vmem:[#allocation5 + $0x1f8] sm:$0xf0] }
  0x49   :  { %1380 = vmatpush.bf16.msrb.mxu2 %v2672_v14  ;;  %1393 = vmatpush.bf16.msrb.mxu3 %v2676_v17  ;;  %v2980_v14 = vor.u32 %v3426_v7, %v2979_v6  ;;  %v2872_v17 = vor.u32 %v3388_v9, %v2869_v10  ;;  %v2685_v40 = vld [vmem:[#allocation5 + $0x2c0] sm:$0xf0]  ;;  %v3354_v43 = vld [vmem:[#allocation5 + $0x2c4] sm:$0xf0]  ;;  %v2587_v48 = vld [vmem:[#allocation5 + $0x1a0] sm:$0xf] }
  0x4a   :  { %1355 = vmatpush.bf16.msrb.mxu0 %v2568_v20  ;;  %v2876_v20 = vor.u32 %v3401_v13, %v2875_v12  ;;  %v2688_v47 = vor.u32 %v3341_v39, %v2685_v40  ;;  %v2692_v51 = vor.u32 %v3354_v43, %v2691_v42  ;;  %v3317_v52 = vld [vmem:[#allocation5 + $0x1a4] sm:$0xf]  ;;  %v3330_v56 = vld [vmem:[#allocation5 + $0x204] sm:$0xf0]  ;;  %v2491_v61 = vld [vmem:[#allocation5 + $0xe0] sm:$0xf] }
  0x4b   :  { %v2589_v53 = vld [vmem:[#allocation5 + $0x200] sm:$0xf0]  ;;  %v3306_v4 = vld [vmem:[#allocation5 + $0x144] sm:$0xf0]  ;;  %v2389_v6 = vld [vmem:[#allocation5 + $0x78] sm:$0xf0] }
  0x4c   :  { %1368 = vmatpush.bf16.msrb.mxu1 %v2572_v23  ;;  %v2880_v23 = vor.u32 %v3389_v15, %v2877_v16  ;;  %v2592_v60 = vor.u32 %v3317_v52, %v2589_v53  ;;  %v3293_v0 = vld [vmem:[#allocation5 + $0xe4] sm:$0xf]  ;;  %v3281_v9 = vld [vmem:[#allocation5 + $0x7c] sm:$0xf0]  ;;  %v3438_v13 = vld [vmem:[#allocation5 + $0x56c] sm:$0xf] }
  0x4d   :  { %1381 = vmatpush.bf16.msrb.mxu2 %v2576_v26  ;;  %1394 = vmatpush.bf16.msrb.mxu3 %v2580_v29  ;;  %v2884_v26 = vor.u32 %v3402_v19, %v2883_v18  ;;  %v2776_v29 = vor.u32 %v3364_v21, %v2773_v22  ;;  %v2493_v1 = vld [vmem:[#allocation5 + $0x140] sm:$0xf0]  ;;  %v2403_v16 = vld [vmem:[#allocation5 + $0x28] sm:$0xf]  ;;  %v3451_v18 = vld [vmem:[#allocation5 + $0x5cc] sm:$0xf0] }
  0x4e   :  { %1356 = vmatpush.bf16.msrb.mxu0 %v2472_v33  ;;  %v3340_v33 = vld [vmem:[#allocation5 + $0x25c] sm:$0xf]  ;;  %v3269_v10 = vld [vmem:[#allocation5 + $0x24] sm:$0xf]  ;;  %v3439_v21 = vld [vmem:[#allocation5 + $0x574] sm:$0xf] }
  0x4f   :  { %v2397_v12 = vld [vmem:[#allocation5 + $0x80] sm:$0xf0]  ;;  %v3085_v22 = vld [vmem:[#allocation5 + $0x5d0] sm:$0xf0]  ;;  %v3091_v25 = vld [vmem:[#allocation5 + $0x578] sm:$0xf] }
  0x50   :  { %1369 = vmatpush.bf16.msrb.mxu1 %v2476_v37  ;;  %v3353_v37 = vld [vmem:[#allocation5 + $0x2bc] sm:$0xf0]  ;;  %v2400_v27 = vor.u32 %v3269_v10, %v2397_v12  ;;  %v2981_v30 = vld [vmem:[#allocation5 + $0x508] sm:$0xf0]  ;;  %v2995_v39 = vld [vmem:[#allocation5 + $0x4b8] sm:$0xf] }
  0x51   :  { %1382 = vmatpush.bf16.msrb.mxu2 %v2480_v41  ;;  %1395 = vmatpush.bf16.msrb.mxu3 %v2484_v45  ;;  %v2680_v41 = vor.u32 %v3340_v33, %v2677_v34  ;;  %v2684_v44 = vor.u32 %v3353_v37, %v2683_v36  ;;  %v3316_v45 = vld [vmem:[#allocation5 + $0x19c] sm:$0xf]  ;;  %v2987_v33 = vld [vmem:[#allocation5 + $0x4b0] sm:$0xf]  ;;  %v3415_v36 = vld [vmem:[#allocation5 + $0x4b4] sm:$0xf] }
  0x52   :  { %1357 = vmatpush.bf16.msrb.mxu0 %v2376_v49  ;;  %v3329_v49 = vld [vmem:[#allocation5 + $0x1fc] sm:$0xf0]  ;;  %v3427_v34 = vld [vmem:[#allocation5 + $0x50c] sm:$0xf0]  ;;  %v2989_v37 = vld [vmem:[#allocation5 + $0x510] sm:$0xf0] }
  0x53   :  { %v2588_v57 = vor.u32 %v3329_v49, %v2587_v48  ;;  %v3428_v40 = vld [vmem:[#allocation5 + $0x514] sm:$0xf0]  ;;  %v3390_v42 = vld [vmem:[#allocation5 + $0x3ec] sm:$0xf]  ;;  %v3391_v48 = vld [vmem:[#allocation5 + $0x3f4] sm:$0xf] }
  0x54   :  { %1370 = vmatpush.bf16.msrb.mxu1 %v2380_v54  ;;  %v2584_v54 = vor.u32 %v3316_v45, %v2581_v46  ;;  %v2885_v43 = vld [vmem:[#allocation5 + $0x448] sm:$0xf0]  ;;  %v2891_v45 = vld [vmem:[#allocation5 + $0x3f0] sm:$0xf]  ;;  %v2893_v49 = vld [vmem:[#allocation5 + $0x450] sm:$0xf0] }
  0x55   :  { %1383 = vmatpush.bf16.msrb.mxu2 %v2384_v58  ;;  %1396 = vmatpush.bf16.msrb.mxu3 %v2388_v62  ;;  %v3292_v58 = vld [vmem:[#allocation5 + $0xdc] sm:$0xf]  ;;  %v3305_v62 = vld [vmem:[#allocation5 + $0x13c] sm:$0xf0]  ;;  %v3403_v46 = vld [vmem:[#allocation5 + $0x44c] sm:$0xf0] }
  0x56   :  { %1402 = vmatpush.bf16.msra.mxu0 %v3064_v55  ;;  %v2595_v55 = vld [vmem:[#allocation5 + $0x1a8] sm:$0xf]  ;;  %v2492_v7 = vor.u32 %v3305_v62, %v2491_v61  ;;  %v2899_v52 = vld [vmem:[#allocation5 + $0x3f8] sm:$0xf]  ;;  %v3367_v61 = vld [vmem:[#allocation5 + $0x334] sm:$0xf] }
  0x57   :  { %1358 = vmatmul.bf16.vlgmr.msrb.gmra.mxu0 %v3699_v50  ;;  %1371 = vmatmul.bf16.vlgmr.msrb.gmra.mxu1 %v3699_v50  ;;  %v3404_v53 = vld [vmem:[#allocation5 + $0x454] sm:$0xf0]  ;;  %v2797_v62 = vld [vmem:[#allocation5 + $0x390] sm:$0xf0] }
  0x58   :  { %1415 = vmatpush.bf16.msra.mxu1 %v3068_v59  ;;  %1384 = vmatmul.bf16.vlgmr.msrb.gmra.mxu2 %v3699_v50  ;;  %v2485_v59 = vld [vmem:[#allocation5 + $0x138] sm:$0xf0]  ;;  %v2701_v10 = vld [vmem:[#allocation5 + $0x2d0] sm:$0xf0]  ;;  %v2707_v12 = vld [vmem:[#allocation5 + $0x278] sm:$0xf] }
  0x59   :  { %1428 = vmatpush.bf16.msra.mxu2 %v3072_v63  ;;  %1441 = vmatpush.bf16.msra.mxu3 %v3076_v2  ;;  %v2596_v63 = vor.u32 %v3330_v56, %v2595_v55  ;;  %v2499_v2 = vld [vmem:[#allocation5 + $0xe8] sm:$0xf]  ;;  %v2488_v3 = vor.u32 %v3292_v58, %v2485_v59  ;;  %v3366_v55 = vld [vmem:[#allocation5 + $0x32c] sm:$0xf]  ;;  %v2795_v58 = vld [vmem:[#allocation5 + $0x330] sm:$0xf] }
  0x5a   :  { %1403 = vmatpush.bf16.msra.mxu0 %v2968_v5  ;;  %1397 = vmatmul.bf16.vlgmr.msrb.gmra.mxu3 %v3699_v50  ;;  %v3268_v5 = vld [vmem:[#allocation5 + $0x1c] sm:$0xf]  ;;  %v2500_v15 = vor.u32 %v3306_v4, %v2499_v2  ;;  %v2789_v56 = vld [vmem:[#allocation5 + $0x388] sm:$0xf0]  ;;  %v3379_v59 = vld [vmem:[#allocation5 + $0x38c] sm:$0xf0] }
  0x5b   :  { %v2392_v19 = vor.u32 %v3268_v5, %v2389_v6  ;;  %v2796_v2 = vor.u32 %v3379_v59, %v2795_v58  ;;  %v2693_v4 = vld [vmem:[#allocation5 + $0x2c8] sm:$0xf0]  ;;  %v2800_v5 = vor.u32 %v3367_v61, %v2797_v62  ;;  %v2699_v6 = vld [vmem:[#allocation5 + $0x270] sm:$0xf]  ;;  %v3107_v59 = vld [vmem:[#allocation5 + $0x588] sm:$0xf] }
  0x5c   :  { %1416 = vmatpush.bf16.msra.mxu1 %v2972_v8  ;;  %v2395_v8 = vld [vmem:[#allocation5 + $0x20] sm:$0xf] }
  0x5d   :  { %1429 = vmatpush.bf16.msra.mxu2 %v2976_v11  ;;  %1442 = vmatpush.bf16.msra.mxu3 %v2980_v14  ;;  %v2496_v11 = vor.u32 %v3293_v0, %v2493_v1  ;;  %v3077_v14 = vld [vmem:[#allocation5 + $0x5c8] sm:$0xf0]  ;;  %v2803_v0 = vld [vmem:[#allocation5 + $0x338] sm:$0xf] }
  0x5e   :  { %1404 = vmatpush.bf16.msra.mxu0 %v2872_v17  ;;  %v3083_v17 = vld [vmem:[#allocation5 + $0x570] sm:$0xf]  ;;  %v3080_v24 = vor.u32 %v3438_v13, %v3077_v14  ;;  %v3380_v1 = vld [vmem:[#allocation5 + $0x394] sm:$0xf0] }
  0x5f   :  { %v3084_v28 = vor.u32 %v3451_v18, %v3083_v17  ;;  %v3356_v13 = vld [vmem:[#allocation5 + $0x2d4] sm:$0xf0]  ;;  %v2603_v18 = vld [vmem:[#allocation5 + $0x1b0] sm:$0xf] }
  0x60   :  { %1417 = vmatpush.bf16.msra.mxu1 %v2876_v20  ;;  %v3282_v20 = vld [vmem:[#allocation5 + $0x84] sm:$0xf0] }
  0x61   :  { %1430 = vmatpush.bf16.msra.mxu2 %v2880_v23  ;;  %1443 = vmatpush.bf16.msra.mxu3 %v2884_v26  ;;  %v2396_v23 = vor.u32 %v3281_v9, %v2395_v8  ;;  %v3452_v26 = vld [vmem:[#allocation5 + $0x5d4] sm:$0xf0]  ;;  %v2404_v31 = vor.u32 %v3282_v20, %v2403_v16  ;;  %v2804_v8 = vor.u32 %v3380_v1, %v2803_v0  ;;  %v3343_v9 = vld [vmem:[#allocation5 + $0x274] sm:$0xf]  ;;  %v2597_v16 = vld [vmem:[#allocation5 + $0x208] sm:$0xf0] }
  0x62   :  { %1405 = vmatpush.bf16.msra.mxu0 %v2776_v29  ;;  %v3414_v29 = vld [vmem:[#allocation5 + $0x4ac] sm:$0xf]  ;;  %v2704_v17 = vor.u32 %v3343_v9, %v2701_v10  ;;  %v2708_v20 = vor.u32 %v3356_v13, %v2707_v12  ;;  %v2997_v0 = vld [vmem:[#allocation5 + $0x518] sm:$0xf0]  ;;  %v3011_v9 = vld [vmem:[#allocation5 + $0x4c8] sm:$0xf] }
  0x63   :  { %v3430_v10 = vld [vmem:[#allocation5 + $0x524] sm:$0xf0]  ;;  %v3392_v12 = vld [vmem:[#allocation5 + $0x3fc] sm:$0xf] }
  0x64   :  { %1418 = vmatpush.bf16.msra.mxu1 %v2780_v32  ;;  %v3088_v32 = vor.u32 %v3439_v21, %v3085_v22  ;;  %v3319_v21 = vld [vmem:[#allocation5 + $0x1b4] sm:$0xf]  ;;  %v2901_v13 = vld [vmem:[#allocation5 + $0x458] sm:$0xf0] }
  0x65   :  { %1431 = vmatpush.bf16.msra.mxu2 %v2784_v35  ;;  %1444 = vmatpush.bf16.msra.mxu3 %v2788_v38  ;;  %v3092_v35 = vor.u32 %v3452_v26, %v3091_v25  ;;  %v2984_v38 = vor.u32 %v3414_v29, %v2981_v30  ;;  %v2605_v22 = vld [vmem:[#allocation5 + $0x210] sm:$0xf0]  ;;  %v3332_v25 = vld [vmem:[#allocation5 + $0x214] sm:$0xf0]  ;;  %v2507_v30 = vld [vmem:[#allocation5 + $0xf0] sm:$0xf] }
  0x66   :  { %1406 = vmatpush.bf16.msra.mxu0 %v2680_v41  ;;  %v2988_v41 = vor.u32 %v3427_v34, %v2987_v33  ;;  %v2608_v29 = vor.u32 %v3319_v21, %v2605_v22  ;;  %v3295_v33 = vld [vmem:[#allocation5 + $0xf4] sm:$0xf]  ;;  %v2915_v21 = vld [vmem:[#allocation5 + $0x408] sm:$0xf] }
  0x67   :  { %v2509_v34 = vld [vmem:[#allocation5 + $0x150] sm:$0xf0]  ;;  %v3406_v22 = vld [vmem:[#allocation5 + $0x464] sm:$0xf0] }
  0x68   :  { %1419 = vmatpush.bf16.msra.mxu1 %v2684_v44  ;;  %v2992_v44 = vor.u32 %v3415_v36, %v2989_v37  ;;  %v3308_v37 = vld [vmem:[#allocation5 + $0x154] sm:$0xf0] }
  0x69   :  { %1432 = vmatpush.bf16.msra.mxu2 %v2688_v47  ;;  %1445 = vmatpush.bf16.msra.mxu3 %v2692_v51  ;;  %v2996_v47 = vor.u32 %v3428_v40, %v2995_v39  ;;  %v2888_v51 = vor.u32 %v3390_v42, %v2885_v43  ;;  %v2405_v39 = vld [vmem:[#allocation5 + $0x88] sm:$0xf0]  ;;  %v3283_v42 = vld [vmem:[#allocation5 + $0x8c] sm:$0xf0]  ;;  %v3271_v43 = vld [vmem:[#allocation5 + $0x34] sm:$0xf] }
  0x6a   :  { %1407 = vmatpush.bf16.msra.mxu0 %v2584_v54  ;;  %v2892_v54 = vor.u32 %v3403_v46, %v2891_v45  ;;  %v2413_v45 = vld [vmem:[#allocation5 + $0x90] sm:$0xf0]  ;;  %v3440_v46 = vld [vmem:[#allocation5 + $0x57c] sm:$0xf] }
  0x6b   :  { %v2416_v61 = vor.u32 %v3271_v43, %v2413_v45  ;;  %v2717_v43 = vld [vmem:[#allocation5 + $0x2e0] sm:$0xf0]  ;;  %v2723_v45 = vld [vmem:[#allocation5 + $0x288] sm:$0xf] }
  0x6c   :  { %1420 = vmatpush.bf16.msra.mxu1 %v2588_v57  ;;  %v2896_v57 = vor.u32 %v3391_v48, %v2893_v49  ;;  %v2419_v49 = vld [vmem:[#allocation5 + $0x38] sm:$0xf] }
  0x6d   :  { %1433 = vmatpush.bf16.msra.mxu2 %v2592_v60  ;;  %1446 = vmatpush.bf16.msra.mxu3 %v2596_v63  ;;  %v2900_v60 = vor.u32 %v3404_v53, %v2899_v52  ;;  %v2792_v63 = vor.u32 %v3366_v55, %v2789_v56  ;;  %v3453_v52 = vld [vmem:[#allocation5 + $0x5dc] sm:$0xf0]  ;;  %v3441_v55 = vld [vmem:[#allocation5 + $0x584] sm:$0xf] }
  0x6e   :  { %1408 = vmatpush.bf16.msra.mxu0 %v2488_v3  ;;  %v3342_v3 = vld [vmem:[#allocation5 + $0x26c] sm:$0xf]  ;;  %v3101_v56 = vld [vmem:[#allocation5 + $0x5e0] sm:$0xf0] }
  0x70   :  { %1421 = vmatpush.bf16.msra.mxu1 %v2492_v7  ;;  %v3355_v7 = vld [vmem:[#allocation5 + $0x2cc] sm:$0xf0] }
  0x71   :  { %1434 = vmatpush.bf16.msra.mxu2 %v2496_v11  ;;  %1447 = vmatpush.bf16.msra.mxu3 %v2500_v15  ;;  %v2696_v11 = vor.u32 %v3342_v3, %v2693_v4  ;;  %v2700_v14 = vor.u32 %v3355_v7, %v2699_v6  ;;  %v3318_v15 = vld [vmem:[#allocation5 + $0x1ac] sm:$0xf]  ;;  %v3003_v3 = vld [vmem:[#allocation5 + $0x4c0] sm:$0xf]  ;;  %v3417_v6 = vld [vmem:[#allocation5 + $0x4c4] sm:$0xf] }
  0x72   :  { %1409 = vmatpush.bf16.msra.mxu0 %v2392_v19  ;;  %v3331_v19 = vld [vmem:[#allocation5 + $0x20c] sm:$0xf0]  ;;  %v3429_v4 = vld [vmem:[#allocation5 + $0x51c] sm:$0xf0]  ;;  %v3005_v7 = vld [vmem:[#allocation5 + $0x520] sm:$0xf0] }
  0x73   :  { %v2604_v26 = vor.u32 %v3331_v19, %v2603_v18  ;;  %v3393_v18 = vld [vmem:[#allocation5 + $0x404] sm:$0xf] }
  0x74   :  { %1422 = vmatpush.bf16.msra.mxu1 %v2396_v23  ;;  %v2600_v23 = vor.u32 %v3318_v15, %v2597_v16  ;;  %v2907_v15 = vld [vmem:[#allocation5 + $0x400] sm:$0xf]  ;;  %v2909_v19 = vld [vmem:[#allocation5 + $0x460] sm:$0xf0] }
  0x75   :  { %1435 = vmatpush.bf16.msra.mxu2 %v2400_v27  ;;  %1448 = vmatpush.bf16.msra.mxu3 %v2404_v31  ;;  %v3294_v27 = vld [vmem:[#allocation5 + $0xec] sm:$0xf]  ;;  %v3307_v31 = vld [vmem:[#allocation5 + $0x14c] sm:$0xf0]  ;;  %v3405_v16 = vld [vmem:[#allocation5 + $0x45c] sm:$0xf0] }
  0x76   :  { %1454 = vmatpush.bf16.msrb.mxu0 %v3080_v24  ;;  %v2611_v24 = vld [vmem:[#allocation5 + $0x1b8] sm:$0xf]  ;;  %v2508_v40 = vor.u32 %v3307_v31, %v2507_v30  ;;  %v3369_v30 = vld [vmem:[#allocation5 + $0x344] sm:$0xf] }
  0x77   :  { %1423 = vmatmul.bf16.vlgmr.msra.gmra.mxu1 %v3699_v50  ;;  %1410 = vmatmul.bf16.vlgmr.msra.gmra.mxu0 %v3699_v50  ;;  %v2813_v31 = vld [vmem:[#allocation5 + $0x3a0] sm:$0xf0] }
  0x78   :  { %1467 = vmatpush.bf16.msrb.mxu1 %v3084_v28  ;;  %1436 = vmatmul.bf16.vlgmr.msra.gmra.mxu2 %v3699_v50  ;;  %v2501_v28 = vld [vmem:[#allocation5 + $0x148] sm:$0xf0] }
  0x79   :  { %1480 = vmatpush.bf16.msrb.mxu2 %v3088_v32  ;;  %1493 = vmatpush.bf16.msrb.mxu3 %v3092_v35  ;;  %v2612_v32 = vor.u32 %v3332_v25, %v2611_v24  ;;  %v2515_v35 = vld [vmem:[#allocation5 + $0xf8] sm:$0xf]  ;;  %v2504_v36 = vor.u32 %v3294_v27, %v2501_v28  ;;  %v3368_v24 = vld [vmem:[#allocation5 + $0x33c] sm:$0xf]  ;;  %v2811_v27 = vld [vmem:[#allocation5 + $0x340] sm:$0xf] }
  0x7a   :  { %1455 = vmatpush.bf16.msrb.mxu0 %v2984_v38  ;;  %1449 = vmatmul.bf16.vlgmr.msra.gmra.mxu3 %v3699_v50  ;;  %v3270_v38 = vld [vmem:[#allocation5 + $0x2c] sm:$0xf]  ;;  %v2516_v48 = vor.u32 %v3308_v37, %v2515_v35  ;;  %v2805_v25 = vld [vmem:[#allocation5 + $0x398] sm:$0xf0]  ;;  %v3381_v28 = vld [vmem:[#allocation5 + $0x39c] sm:$0xf0] }
  0x7b   :  { %v2408_v53 = vor.u32 %v3270_v38, %v2405_v39  ;;  %v2812_v35 = vor.u32 %v3381_v28, %v2811_v27  ;;  %v2709_v37 = vld [vmem:[#allocation5 + $0x2d8] sm:$0xf0]  ;;  %v2816_v38 = vor.u32 %v3369_v30, %v2813_v31  ;;  %v2715_v39 = vld [vmem:[#allocation5 + $0x280] sm:$0xf]  ;;  %v3123_v28 = vld [vmem:[#allocation5 + $0x598] sm:$0xf] }
  0x7c   :  { %1468 = vmatpush.bf16.msrb.mxu1 %v2988_v41  ;;  %v2411_v41 = vld [vmem:[#allocation5 + $0x30] sm:$0xf] }
  0x7d   :  { %1481 = vmatpush.bf16.msrb.mxu2 %v2992_v44  ;;  %1494 = vmatpush.bf16.msrb.mxu3 %v2996_v47  ;;  %v2512_v44 = vor.u32 %v3295_v33, %v2509_v34  ;;  %v3093_v47 = vld [vmem:[#allocation5 + $0x5d8] sm:$0xf0]  ;;  %v2819_v33 = vld [vmem:[#allocation5 + $0x348] sm:$0xf] }
  0x7e   :  { %1456 = vmatpush.bf16.msrb.mxu0 %v2888_v51  ;;  %v3099_v51 = vld [vmem:[#allocation5 + $0x580] sm:$0xf]  ;;  %v3096_v58 = vor.u32 %v3440_v46, %v3093_v47  ;;  %v3382_v34 = vld [vmem:[#allocation5 + $0x3a4] sm:$0xf0] }
  0x7f   :  { %v3100_v62 = vor.u32 %v3453_v52, %v3099_v51  ;;  %v3358_v46 = vld [vmem:[#allocation5 + $0x2e4] sm:$0xf0]  ;;  %v2619_v52 = vld [vmem:[#allocation5 + $0x1c0] sm:$0xf] }
  0x80   :  { %1469 = vmatpush.bf16.msrb.mxu1 %v2892_v54  ;;  %v3284_v54 = vld [vmem:[#allocation5 + $0x94] sm:$0xf0] }
  0x81   :  { %1482 = vmatpush.bf16.msrb.mxu2 %v2896_v57  ;;  %1495 = vmatpush.bf16.msrb.mxu3 %v2900_v60  ;;  %v2412_v57 = vor.u32 %v3283_v42, %v2411_v41  ;;  %v3454_v60 = vld [vmem:[#allocation5 + $0x5e4] sm:$0xf0]  ;;  %v2420_v1 = vor.u32 %v3284_v54, %v2419_v49  ;;  %v2820_v41 = vor.u32 %v3382_v34, %v2819_v33  ;;  %v3345_v42 = vld [vmem:[#allocation5 + $0x284] sm:$0xf]  ;;  %v2613_v49 = vld [vmem:[#allocation5 + $0x218] sm:$0xf0] }
  0x82   :  { %1457 = vmatpush.bf16.msrb.mxu0 %v2792_v63  ;;  %v3416_v63 = vld [vmem:[#allocation5 + $0x4bc] sm:$0xf]  ;;  %v2720_v51 = vor.u32 %v3345_v42, %v2717_v43  ;;  %v2724_v54 = vor.u32 %v3358_v46, %v2723_v45  ;;  %v3418_v34 = vld [vmem:[#allocation5 + $0x4cc] sm:$0xf]  ;;  %v3432_v42 = vld [vmem:[#allocation5 + $0x534] sm:$0xf0] }
  0x83   :  { %v3394_v46 = vld [vmem:[#allocation5 + $0x40c] sm:$0xf] }
  0x84   :  { %1470 = vmatpush.bf16.msrb.mxu1 %v2796_v2  ;;  %v3104_v2 = vor.u32 %v3441_v55, %v3101_v56  ;;  %v3321_v55 = vld [vmem:[#allocation5 + $0x1c4] sm:$0xf] }
  0x85   :  { %1483 = vmatpush.bf16.msrb.mxu2 %v2800_v5  ;;  %1496 = vmatpush.bf16.msrb.mxu3 %v2804_v8  ;;  %v3108_v5 = vor.u32 %v3454_v60, %v3107_v59  ;;  %v3000_v8 = vor.u32 %v3416_v63, %v2997_v0  ;;  %v2621_v56 = vld [vmem:[#allocation5 + $0x220] sm:$0xf0]  ;;  %v3334_v59 = vld [vmem:[#allocation5 + $0x224] sm:$0xf0]  ;;  %v2523_v0 = vld [vmem:[#allocation5 + $0x100] sm:$0xf] }
  0x86   :  { %1458 = vmatpush.bf16.msrb.mxu0 %v2696_v11  ;;  %v3004_v11 = vor.u32 %v3429_v4, %v3003_v3  ;;  %v2624_v63 = vor.u32 %v3321_v55, %v2621_v56  ;;  %v3297_v3 = vld [vmem:[#allocation5 + $0x104] sm:$0xf]  ;;  %v3408_v55 = vld [vmem:[#allocation5 + $0x474] sm:$0xf0] }
  0x87   :  { %v2525_v4 = vld [vmem:[#allocation5 + $0x160] sm:$0xf0] }
  0x88   :  { %1471 = vmatpush.bf16.msrb.mxu1 %v2700_v14  ;;  %v3008_v14 = vor.u32 %v3417_v6, %v3005_v7  ;;  %v3310_v7 = vld [vmem:[#allocation5 + $0x164] sm:$0xf0] }
  0x89   :  { %1484 = vmatpush.bf16.msrb.mxu2 %v2704_v17  ;;  %1497 = vmatpush.bf16.msrb.mxu3 %v2708_v20  ;;  %v3012_v17 = vor.u32 %v3430_v10, %v3011_v9  ;;  %v2904_v20 = vor.u32 %v3392_v12, %v2901_v13  ;;  %v2421_v9 = vld [vmem:[#allocation5 + $0x98] sm:$0xf0]  ;;  %v3285_v12 = vld [vmem:[#allocation5 + $0x9c] sm:$0xf0]  ;;  %v3273_v13 = vld [vmem:[#allocation5 + $0x44] sm:$0xf] }
  0x8a   :  { %1459 = vmatpush.bf16.msrb.mxu0 %v2600_v23  ;;  %v2908_v23 = vor.u32 %v3405_v16, %v2907_v15  ;;  %v2429_v15 = vld [vmem:[#allocation5 + $0xa0] sm:$0xf0]  ;;  %v3442_v16 = vld [vmem:[#allocation5 + $0x58c] sm:$0xf] }
  0x8b   :  { %v2432_v30 = vor.u32 %v3273_v13, %v2429_v15  ;;  %v2733_v13 = vld [vmem:[#allocation5 + $0x2f0] sm:$0xf0]  ;;  %v3360_v15 = vld [vmem:[#allocation5 + $0x2f4] sm:$0xf0] }
  0x8c   :  { %1472 = vmatpush.bf16.msrb.mxu1 %v2604_v26  ;;  %v2912_v26 = vor.u32 %v3393_v18, %v2909_v19  ;;  %v2435_v19 = vld [vmem:[#allocation5 + $0x48] sm:$0xf] }
  0x8d   :  { %1485 = vmatpush.bf16.msrb.mxu2 %v2608_v29  ;;  %1498 = vmatpush.bf16.msrb.mxu3 %v2612_v32  ;;  %v2916_v29 = vor.u32 %v3406_v22, %v2915_v21  ;;  %v2808_v32 = vor.u32 %v3368_v24, %v2805_v25  ;;  %v3455_v21 = vld [vmem:[#allocation5 + $0x5ec] sm:$0xf0]  ;;  %v3443_v24 = vld [vmem:[#allocation5 + $0x594] sm:$0xf] }
  0x8e   :  { %1460 = vmatpush.bf16.msrb.mxu0 %v2504_v36  ;;  %v3344_v36 = vld [vmem:[#allocation5 + $0x27c] sm:$0xf]  ;;  %v3117_v25 = vld [vmem:[#allocation5 + $0x5f0] sm:$0xf0] }
  0x8f   :  { %v3120_v33 = vor.u32 %v3443_v24, %v3117_v25  ;;  %v3323_v24 = vld [vmem:[#allocation5 + $0x1d4] sm:$0xf] }
  0x90   :  { %1473 = vmatpush.bf16.msrb.mxu1 %v2508_v40  ;;  %v3357_v40 = vld [vmem:[#allocation5 + $0x2dc] sm:$0xf0]  ;;  %v2637_v25 = vld [vmem:[#allocation5 + $0x230] sm:$0xf0] }
  0x91   :  { %1486 = vmatpush.bf16.msrb.mxu2 %v2512_v44  ;;  %1499 = vmatpush.bf16.msrb.mxu3 %v2516_v48  ;;  %v2712_v44 = vor.u32 %v3344_v36, %v2709_v37  ;;  %v2716_v47 = vor.u32 %v3357_v40, %v2715_v39  ;;  %v3320_v48 = vld [vmem:[#allocation5 + $0x1bc] sm:$0xf]  ;;  %v3019_v36 = vld [vmem:[#allocation5 + $0x4d0] sm:$0xf]  ;;  %v3419_v39 = vld [vmem:[#allocation5 + $0x4d4] sm:$0xf] }
  0x92   :  { %1461 = vmatpush.bf16.msrb.mxu0 %v2408_v53  ;;  %v3333_v53 = vld [vmem:[#allocation5 + $0x21c] sm:$0xf0]  ;;  %v3021_v40 = vld [vmem:[#allocation5 + $0x530] sm:$0xf0] }
  0x93   :  { %v2620_v60 = vor.u32 %v3333_v53, %v2619_v52  ;;  %v3024_v45 = vor.u32 %v3419_v39, %v3021_v40  ;;  %v3395_v52 = vld [vmem:[#allocation5 + $0x414] sm:$0xf]  ;;  %v2547_v40 = vld [vmem:[#allocation5 + $0x118] sm:$0xf] }
  0x94   :  { %1474 = vmatpush.bf16.msrb.mxu1 %v2412_v57  ;;  %v2616_v57 = vor.u32 %v3320_v48, %v2613_v49  ;;  %v2923_v48 = vld [vmem:[#allocation5 + $0x410] sm:$0xf]  ;;  %v2925_v53 = vld [vmem:[#allocation5 + $0x470] sm:$0xf0] }
  0x95   :  { %1487 = vmatpush.bf16.msrb.mxu2 %v2416_v61  ;;  %1500 = vmatpush.bf16.msrb.mxu3 %v2420_v1  ;;  %v3296_v61 = vld [vmem:[#allocation5 + $0xfc] sm:$0xf]  ;;  %v3309_v1 = vld [vmem:[#allocation5 + $0x15c] sm:$0xf0] }
  0x96   :  { %1506 = vmatpush.bf16.msra.mxu0 %v3096_v58  ;;  %v2627_v58 = vld [vmem:[#allocation5 + $0x1c8] sm:$0xf]  ;;  %v2524_v10 = vor.u32 %v3309_v1, %v2523_v0  ;;  %v3371_v0 = vld [vmem:[#allocation5 + $0x354] sm:$0xf] }
  0x97   :  { %1475 = vmatmul.bf16.vlgmr.msrb.gmra.mxu1 %v3699_v50  ;;  %1462 = vmatmul.bf16.vlgmr.msrb.gmra.mxu0 %v3699_v50  ;;  %v2829_v1 = vld [vmem:[#allocation5 + $0x3b0] sm:$0xf0] }
  0x98   :  { %1519 = vmatpush.bf16.msra.mxu1 %v3100_v62  ;;  %1488 = vmatmul.bf16.vlgmr.msrb.gmra.mxu2 %v3699_v50  ;;  %v2517_v62 = vld [vmem:[#allocation5 + $0x158] sm:$0xf0] }
  0x99   :  { %1532 = vmatpush.bf16.msra.mxu2 %v3104_v2  ;;  %1545 = vmatpush.bf16.msra.mxu3 %v3108_v5  ;;  %v2628_v2 = vor.u32 %v3334_v59, %v2627_v58  ;;  %v2531_v5 = vld [vmem:[#allocation5 + $0x108] sm:$0xf]  ;;  %v2520_v6 = vor.u32 %v3296_v61, %v2517_v62  ;;  %v2928_v58 = vor.u32 %v3395_v52, %v2925_v53  ;;  %v3370_v59 = vld [vmem:[#allocation5 + $0x34c] sm:$0xf]  ;;  %v2827_v61 = vld [vmem:[#allocation5 + $0x350] sm:$0xf] }
  0x9a   :  { %1507 = vmatpush.bf16.msra.mxu0 %v3000_v8  ;;  %1501 = vmatmul.bf16.vlgmr.msrb.gmra.mxu3 %v3699_v50  ;;  %v3272_v8 = vld [vmem:[#allocation5 + $0x3c] sm:$0xf]  ;;  %v2532_v18 = vor.u32 %v3310_v7, %v2531_v5  ;;  %v3346_v7 = vld [vmem:[#allocation5 + $0x28c] sm:$0xf]  ;;  %v2445_v52 = vld [vmem:[#allocation5 + $0xb0] sm:$0xf0] }
  0x9b   :  { %v2424_v22 = vor.u32 %v3272_v8, %v2421_v9  ;;  %v2725_v8 = vld [vmem:[#allocation5 + $0x2e8] sm:$0xf0]  ;;  %v2731_v9 = vld [vmem:[#allocation5 + $0x290] sm:$0xf]  ;;  %v2451_v53 = vld [vmem:[#allocation5 + $0x58] sm:$0xf] }
  0x9c   :  { %1520 = vmatpush.bf16.msra.mxu1 %v3004_v11  ;;  %v2427_v11 = vld [vmem:[#allocation5 + $0x40] sm:$0xf] }
  0x9d   :  { %1533 = vmatpush.bf16.msra.mxu2 %v3008_v14  ;;  %1546 = vmatpush.bf16.msra.mxu3 %v3012_v17  ;;  %v2528_v14 = vor.u32 %v3297_v3, %v2525_v4  ;;  %v3109_v17 = vld [vmem:[#allocation5 + $0x5e8] sm:$0xf0]  ;;  %v3384_v3 = vld [vmem:[#allocation5 + $0x3b4] sm:$0xf0] }
  0x9e   :  { %1508 = vmatpush.bf16.msra.mxu0 %v2904_v20  ;;  %v3115_v20 = vld [vmem:[#allocation5 + $0x590] sm:$0xf]  ;;  %v3112_v27 = vor.u32 %v3442_v16, %v3109_v17  ;;  %v2728_v16 = vor.u32 %v3346_v7, %v2725_v8  ;;  %v2933_v7 = vld [vmem:[#allocation5 + $0x478] sm:$0xf0] }
  0x9f   :  { %v3116_v31 = vor.u32 %v3455_v21, %v3115_v20  ;;  %v2629_v20 = vld [vmem:[#allocation5 + $0x228] sm:$0xf0]  ;;  %v2635_v21 = vld [vmem:[#allocation5 + $0x1d0] sm:$0xf] }
  0xa0   :  { %1521 = vmatpush.bf16.msra.mxu1 %v2908_v23  ;;  %v3286_v23 = vld [vmem:[#allocation5 + $0xa4] sm:$0xf0] }
  0xa1   :  { %1534 = vmatpush.bf16.msra.mxu2 %v2912_v26  ;;  %1547 = vmatpush.bf16.msra.mxu3 %v2916_v29  ;;  %v2428_v26 = vor.u32 %v3285_v12, %v2427_v11  ;;  %v3456_v29 = vld [vmem:[#allocation5 + $0x5f4] sm:$0xf0]  ;;  %v3359_v11 = vld [vmem:[#allocation5 + $0x2ec] sm:$0xf0]  ;;  %v3347_v12 = vld [vmem:[#allocation5 + $0x294] sm:$0xf] }
  0xa2   :  { %1509 = vmatpush.bf16.msra.mxu0 %v2808_v32  ;;  %v2436_v32 = vor.u32 %v3286_v23, %v2435_v19  ;;  %v3124_v37 = vor.u32 %v3456_v29, %v3123_v28  ;;  %v2732_v17 = vor.u32 %v3359_v11, %v2731_v9  ;;  %v3322_v19 = vld [vmem:[#allocation5 + $0x1cc] sm:$0xf]  ;;  %v3335_v23 = vld [vmem:[#allocation5 + $0x22c] sm:$0xf0]  ;;  %v3336_v28 = vld [vmem:[#allocation5 + $0x234] sm:$0xf0] }
  0xa3   :  { %v2632_v29 = vor.u32 %v3322_v19, %v2629_v20  ;;  %v3732_v9 = vld [vmem:[#allocation8 + $0x38] sm:$0xff] }
  0xa4   :  { %1522 = vmatpush.bf16.msra.mxu1 %v2812_v35  ;;  %v3013_v35 = vld [vmem:[#allocation5 + $0x528] sm:$0xf0]  ;;  %v3372_v11 = vld [vmem:[#allocation5 + $0x35c] sm:$0xf] }
  0xa5   :  { %1535 = vmatpush.bf16.msra.mxu2 %v2816_v38  ;;  %1548 = vmatpush.bf16.msra.mxu3 %v2820_v41  ;;  %v3431_v38 = vld [vmem:[#allocation5 + $0x52c] sm:$0xf0]  ;;  %v3027_v41 = vld [vmem:[#allocation5 + $0x4d8] sm:$0xf]  ;;  %v3016_v43 = vor.u32 %v3418_v34, %v3013_v35 }
  0xa6   :  { %1510 = vmatpush.bf16.msra.mxu0 %v2712_v44  ;;  %v3020_v44 = vor.u32 %v3431_v38, %v3019_v36  ;;  %v3028_v49 = vor.u32 %v3432_v42, %v3027_v41  ;;  %v2539_v34 = vld [vmem:[#allocation5 + $0x110] sm:$0xf]  ;;  %v2541_v38 = vld [vmem:[#allocation5 + $0x170] sm:$0xf0]  ;;  %v3312_v41 = vld [vmem:[#allocation5 + $0x174] sm:$0xf0] }
  0xa7   :  { %v3311_v36 = vld [vmem:[#allocation5 + $0x16c] sm:$0xf0] }
  0xa8   :  { %1523 = vmatpush.bf16.msra.mxu1 %v2716_v47  ;;  %v2917_v47 = vld [vmem:[#allocation5 + $0x468] sm:$0xf0] }
  0xa9   :  { %1536 = vmatpush.bf16.msra.mxu2 %v2720_v51  ;;  %1549 = vmatpush.bf16.msra.mxu3 %v2724_v54  ;;  %v3407_v51 = vld [vmem:[#allocation5 + $0x46c] sm:$0xf0]  ;;  %v2931_v54 = vld [vmem:[#allocation5 + $0x418] sm:$0xf]  ;;  %v2920_v56 = vor.u32 %v3394_v46, %v2917_v47  ;;  %v2437_v46 = vld [vmem:[#allocation5 + $0xa8] sm:$0xf0] }
  0xaa   :  { %1511 = vmatpush.bf16.msra.mxu0 %v2616_v57  ;;  %v2924_v57 = vor.u32 %v3407_v51, %v2923_v48  ;;  %v2932_v62 = vor.u32 %v3408_v55, %v2931_v54  ;;  %v2443_v47 = vld [vmem:[#allocation5 + $0x50] sm:$0xf]  ;;  %v3275_v51 = vld [vmem:[#allocation5 + $0x54] sm:$0xf] }
  0xab   :  { %v3287_v48 = vld [vmem:[#allocation5 + $0xac] sm:$0xf0] }
  0xac   :  { %1524 = vmatpush.bf16.msra.mxu1 %v2620_v60  ;;  %v2821_v60 = vld [vmem:[#allocation5 + $0x3a8] sm:$0xf0] }
  0xad   :  { %1537 = vmatpush.bf16.msra.mxu2 %v2624_v63  ;;  %1550 = vmatpush.bf16.msra.mxu3 %v2628_v2  ;;  %v3383_v63 = vld [vmem:[#allocation5 + $0x3ac] sm:$0xf0]  ;;  %v2835_v2 = vld [vmem:[#allocation5 + $0x358] sm:$0xf]  ;;  %v2824_v4 = vor.u32 %v3370_v59, %v2821_v60 }
  0xae   :  { %1512 = vmatpush.bf16.msra.mxu0 %v2520_v6  ;;  %v2828_v5 = vor.u32 %v3383_v63, %v2827_v61  ;;  %v2832_v6 = vor.u32 %v3371_v0, %v2829_v1  ;;  %v2444_v61 = vor.u32 %v3287_v48, %v2443_v47 }
  0xb0   :  { %1525 = vmatpush.bf16.msra.mxu1 %v2524_v10  ;;  %v2836_v10 = vor.u32 %v3384_v3, %v2835_v2  ;;  %v3420_v2 = vld [vmem:[#allocation5 + $0x4dc] sm:$0xf] }
  0xb1   :  { %1538 = vmatpush.bf16.msra.mxu2 %v2528_v14  ;;  %1551 = vmatpush.bf16.msra.mxu3 %v2532_v18  ;;  %v2739_v14 = vld [vmem:[#allocation5 + $0x298] sm:$0xf]  ;;  %v2736_v18 = vor.u32 %v3347_v12, %v2733_v13  ;;  %v3029_v3 = vld [vmem:[#allocation5 + $0x538] sm:$0xf0]  ;;  %v3738_v13 = vld [vmem:[#allocation8 + $0x30] sm:$0xff] }
  0xb2   :  { %1513 = vmatpush.bf16.msra.mxu0 %v2424_v22  ;;  %v2740_v22 = vor.u32 %v3360_v15, %v2739_v14  ;;  %v2837_v12 = vld [vmem:[#allocation5 + $0x3b8] sm:$0xf0] }
  0xb3   :  { %v2840_v14 = vor.u32 %v3372_v11, %v2837_v12  ;;  %v3348_v15 = vld [vmem:[#allocation5 + $0x29c] sm:$0xf]  ;;  %v3171_v12 = vld [vmem:[#allocation7 + $0xd0] sm:$0xf] }
  0xb4   :  { %1526 = vmatpush.bf16.msra.mxu1 %v2428_v26  ;;  %v153_v26 = vpop.f32.mrf.mxu0  ;;  %v3725_v39 = vpop.f32.mrf.mxu1 }
  0xb5   :  { %1539 = vmatpush.bf16.msra.mxu2 %v2432_v30  ;;  %1552 = vmatpush.bf16.msra.mxu3 %v2436_v32  ;;  %158 = vst.msk [vmem:[%s4054_s4] sm:$0x3] %vm157_vm0, %v153_v26  ;;  %v2636_v30 = vor.u32 %v3335_v23, %v2635_v21  ;;  %v3298_v32 = vld [vmem:[#allocation5 + $0x10c] sm:$0xf]  ;;  %v3324_v21 = vld [vmem:[#allocation5 + $0x1dc] sm:$0xf] }
  0xb6   :  { %1558 = vmatpush.bf16.msrb.mxu0 %v3112_v27  ;;  %v2643_v27 = vld [vmem:[#allocation5 + $0x1d8] sm:$0xf]  ;;  %v3748_v23 = vld [vmem:[#allocation8 + $0x20] sm:$0xff]  ;;  %v2549_v26 = vld [vmem:[#allocation5 + $0x178] sm:$0xf0] }
  0xb7   :  { %1514 = vmatmul.bf16.vlgmr.msra.gmra.mxu0 %v3699_v50  ;;  %1527 = vmatmul.bf16.vlgmr.msra.gmra.mxu1 %v3699_v50  ;;  %v2644_v35 = vor.u32 %v3336_v28, %v2643_v27  ;;  %v3751_v27 = vld [vmem:[#allocation8 + $0x18] sm:$0xff] }
  0xb8   :  { %1571 = vmatpush.bf16.msrb.mxu1 %v3116_v31  ;;  %1540 = vmatmul.bf16.vlgmr.msra.gmra.mxu2 %v3699_v50  ;;  %v2640_v31 = vor.u32 %v3323_v24, %v2637_v25  ;;  %v3300_v25 = vld [vmem:[#allocation5 + $0x11c] sm:$0xf] }
  0xb9   :  { %1584 = vmatpush.bf16.msrb.mxu2 %v3120_v33  ;;  %1597 = vmatpush.bf16.msrb.mxu3 %v3124_v37  ;;  %v2533_v33 = vld [vmem:[#allocation5 + $0x168] sm:$0xf0]  ;;  %v3299_v37 = vld [vmem:[#allocation5 + $0x114] sm:$0xf] }
  0xba   :  { %1553 = vmatmul.bf16.vlgmr.msra.gmra.mxu3 %v3699_v50  ;;  %1559 = vmatpush.bf16.msrb.mxu0 %v3016_v43  ;;  %v2536_v42 = vor.u32 %v3298_v32, %v2533_v33  ;;  %v3274_v43 = vld [vmem:[#allocation5 + $0x4c] sm:$0xf]  ;;  %v2552_v32 = vor.u32 %v3300_v25, %v2549_v26  ;;  %v3276_v33 = vld [vmem:[#allocation5 + $0x5c] sm:$0xf] }
  0xbb   :  { %v3727_v55 = vpop.f32.mrf.mxu2  ;;  %v2440_v60 = vor.u32 %v3274_v43, %v2437_v46 }
  0xbc   :  { %1572 = vmatpush.bf16.msrb.mxu1 %v3020_v44  ;;  %v2540_v44 = vor.u32 %v3311_v36, %v2539_v34  ;;  %v155_v54 = vpop.f32.mrf.mxu0  ;;  %v1322_v1 = vpop.f32.mrf.mxu1  ;;  %v2453_v34 = vld [vmem:[#allocation5 + $0xb8] sm:$0xf0] }
  0xbd   :  { %1585 = vmatpush.bf16.msrb.mxu2 %v3024_v45  ;;  %1598 = vmatpush.bf16.msrb.mxu3 %v3028_v49  ;;  %v2544_v45 = vor.u32 %v3299_v37, %v2541_v38  ;;  %v2548_v49 = vor.u32 %v3312_v41, %v2547_v40  ;;  %v3729_v59 = vpop.f32.mrf.mxu3  ;;  %v2456_v36 = vor.u32 %v3276_v33, %v2453_v34  ;;  %v3761_v37 = vld [vmem:[#allocation8 + $0x8] sm:$0xff]  ;;  %v3764_v41 = vld [vmem:[#allocation8] sm:$0xff]  ;;  %v3472_v54 = vld [vmem:[#allocation7 + $0xf4] sm:$0xf0] }
  0xbe   :  { %1560 = vmatpush.bf16.msrb.mxu0 %v2920_v56  ;;  %v3288_v56 = vld [vmem:[#allocation5 + $0xb4] sm:$0xf0]  ;;  %v3469_v1 = vld [vmem:[#allocation7 + $0xe4] sm:$0xf] }
  0xbf   :  { %v2452_v63 = vor.u32 %v3288_v56, %v2451_v53  ;;  %v3187_v53 = vld [vmem:[#allocation7 + $0xf0] sm:$0xf]  ;;  %v3471_v56 = vld [vmem:[#allocation7 + $0xf4] sm:$0xf] }
  0xc0   :  { %1573 = vmatpush.bf16.msrb.mxu1 %v2924_v57  ;;  %v3444_v57 = vld [vmem:[#allocation5 + $0x59c] sm:$0xf] }
  0xc1   :  { %1586 = vmatpush.bf16.msrb.mxu2 %v2928_v58  ;;  %1599 = vmatpush.bf16.msrb.mxu3 %v2932_v62  ;;  %v3125_v58 = vld [vmem:[#allocation5 + $0x5f8] sm:$0xf0]  ;;  %v2448_v62 = vor.u32 %v3275_v51, %v2445_v52  ;;  %v1623_v51 = vmul.f32 %v3725_v39, %v3725_v39 }
  0xc2   :  { %1561 = vmatpush.bf16.msrb.mxu0 %v2824_v4  ;;  %v3128_v0 = vor.u32 %v3444_v57, %v3125_v58  ;;  %v3032_v4 = vor.u32 %v3420_v2, %v3029_v3  ;;  %v3188_v57 = vor.u32 %v3472_v54, %v3187_v53  ;;  %v3189_v58 = vld [vmem:[#allocation7 + $0xf8] sm:$0xf0]  ;;  %v3181_v2 = vld [vmem:[#allocation7 + $0xe8] sm:$0xf0] }
  0xc3   :  { %v3157_v53 = vld [vmem:[#allocation7 + $0xb8] sm:$0xf0] }
  0xc4   :  { %1574 = vmatpush.bf16.msrb.mxu1 %v2828_v5  ;;  %v1335_v5 = vpop.f32.mrf.mxu2 }
  0xc5   :  { %1587 = vmatpush.bf16.msrb.mxu2 %v2832_v6  ;;  %1600 = vmatpush.bf16.msrb.mxu3 %v2836_v10  ;;  %v3396_v6 = vld [vmem:[#allocation5 + $0x41c] sm:$0xf]  ;;  %v1348_v8 = vpop.f32.mrf.mxu3  ;;  %v1624_v5 = vmul.f32 %v3727_v55, %v3727_v55 }
  0xc6   :  { %1562 = vmatpush.bf16.msrb.mxu0 %v2728_v16  ;;  %v2936_v10 = vor.u32 %v3396_v6, %v2933_v7  ;;  %v2741_v16 = vld [vmem:[#allocation5 + $0x2f8] sm:$0xf0] }
  0xc7   :  { %v2744_v20 = vor.u32 %v3348_v15, %v2741_v16  ;;  %v3467_v15 = vld [vmem:[#allocation7 + $0xd4] sm:$0xf] }
  0xc8   :  { %1575 = vmatpush.bf16.msrb.mxu1 %v2732_v17  ;;  %v3741_v17 = vld [vmem:[#allocation8 + $0x28] sm:$0xff] }
  0xc9   :  { %1588 = vmatpush.bf16.msrb.mxu2 %v2736_v18  ;;  %1601 = vmatpush.bf16.msrb.mxu3 %v2740_v22  ;;  %v2645_v22 = vld [vmem:[#allocation5 + $0x238] sm:$0xf0] }
  0xca   :  { %1563 = vmatpush.bf16.msrb.mxu0 %v2632_v29  ;;  %v2648_v24 = vor.u32 %v3324_v21, %v2645_v22  ;;  %v3173_v21 = vld [vmem:[#allocation7 + $0xd8] sm:$0xf0] }
  0xcb   :  { %v3176_v25 = vor.u32 %v3467_v15, %v3173_v21  ;;  %v3139_v15 = vld [vmem:[#allocation7 + $0x90] sm:$0xf] }
  0xcc   :  { %1576 = vmatpush.bf16.msrb.mxu1 %v2636_v30 }
  0xcd   :  { %1589 = vmatpush.bf16.msrb.mxu2 %v2640_v31  ;;  %1602 = vmatpush.bf16.msrb.mxu3 %v2644_v35  ;;  %v3758_v35 = vld [vmem:[#allocation8 + $0x10] sm:$0xff] }
  0xce   :  { %1564 = vmatpush.bf16.msrb.mxu0 %v2536_v42 }
  0xd0   :  { %1577 = vmatpush.bf16.msrb.mxu1 %v2540_v44 }
  0xd1   :  { %1590 = vmatpush.bf16.msrb.mxu2 %v2544_v45  ;;  %1603 = vmatpush.bf16.msrb.mxu3 %v2548_v49 }
  0xd2   :  { %1565 = vmatpush.bf16.msrb.mxu0 %v2440_v60 }
  0xd4   :  { %1578 = vmatpush.bf16.msrb.mxu1 %v2444_v61  ;;  %v3744_v18 = vpop.f32.mrf.mxu0  ;;  %v3746_v19 = vpop.f32.mrf.mxu1 }
  0xd5   :  { %1591 = vmatpush.bf16.msrb.mxu2 %v2448_v62  ;;  %1604 = vmatpush.bf16.msrb.mxu3 %v2452_v63  ;;  %v3192_v62 = vor.u32 %v3471_v56, %v3189_v58  ;;  %v3179_v63 = vld [vmem:[#allocation7 + $0xe0] sm:$0xf] }
  0xd6   :  { %1610 = vmatpush.bf16.msra.mxu0 %v3128_v0  ;;  %v3470_v0 = vld [vmem:[#allocation7 + $0xe4] sm:$0xf0] }
  0xd7   :  { %1566 = vmatmul.bf16.vlgmr.msrb.gmra.mxu0 %v3699_v50  ;;  %1579 = vmatmul.bf16.vlgmr.msrb.gmra.mxu1 %v3699_v50  ;;  %v3180_v3 = vor.u32 %v3470_v0, %v3179_v63  ;;  %v3147_v0 = vld [vmem:[#allocation7 + $0xa0] sm:$0xf] }
  0xd8   :  { %1820 = vmatpush.bf16.msra.mxu1 %v3732_v9  ;;  %1592 = vmatmul.bf16.vlgmr.msrb.gmra.mxu2 %v3699_v50 }
  0xd9   :  { %1605 = vmatmul.bf16.vlgmr.msrb.gmra.mxu3 %v3699_v50  ;;  %2020 = vmatpush.bf16.msra.mxu2 %v3188_v57 }
  0xda   :  { %1611 = vmatpush.bf16.msra.mxu0 %v3032_v4  ;;  %2033 = vmatpush.bf16.msra.mxu3 %v3192_v62  ;;  %v3184_v4 = vor.u32 %v3469_v1, %v3181_v2  ;;  %v3462_v1 = vld [vmem:[#allocation7 + $0xa4] sm:$0xf0]  ;;  %v3461_v2 = vld [vmem:[#allocation7 + $0xa4] sm:$0xf] }
  0xdb   :  { %v3754_v29 = vpop.f32.mrf.mxu2 }
  0xdc   :  { %1821 = vmatpush.bf16.msra.mxu1 %v3738_v13  ;;  %v1361_v28 = vpop.f32.mrf.mxu0  ;;  %v1374_v31 = vpop.f32.mrf.mxu1 }
  0xdd   :  { %v3756_v30 = vpop.f32.mrf.mxu3  ;;  %2021 = vmatpush.bf16.msra.mxu2 %v3180_v3  ;;  %v3466_v31 = vld [vmem:[#allocation7 + $0xc4] sm:$0xf0] }
  0xde   :  { %1612 = vmatpush.bf16.msra.mxu0 %v2936_v10  ;;  %v1625_v10 = vmul.f32 %v3729_v59, %v3729_v59  ;;  %2034 = vmatpush.bf16.msra.mxu3 %v3184_v4  ;;  %v3163_v59 = vld [vmem:[#allocation7 + $0xc0] sm:$0xf]  ;;  %v3148_v4 = vor.u32 %v3462_v1, %v3147_v0 }
  0xdf   :  { %v3164_v34 = vor.u32 %v3466_v31, %v3163_v59  ;;  %v3141_v59 = vld [vmem:[#allocation7 + $0x98] sm:$0xf0] }
  0xe0   :  { %1822 = vmatpush.bf16.msra.mxu1 %v3741_v17 }
  0xe2   :  { %1613 = vmatpush.bf16.msra.mxu0 %v2840_v14  ;;  %v3468_v14 = vld [vmem:[#allocation7 + $0xd4] sm:$0xf0]  ;;  %2035 = vmatpush.bf16.msra.mxu3 %v3176_v25 }
  0xe3   :  { %v1387_v38 = vpop.f32.mrf.mxu2 }
  0xe4   :  { %1823 = vmatpush.bf16.msra.mxu1 %v3748_v23 }
  0xe5   :  { %v1400_v40 = vpop.f32.mrf.mxu3 }
  0xe6   :  { %1614 = vmatpush.bf16.msra.mxu0 %v2744_v20  ;;  %v3172_v20 = vor.u32 %v3468_v14, %v3171_v12 }
  0xe8   :  { %1824 = vmatpush.bf16.msra.mxu1 %v3751_v27  ;;  %2022 = vmatpush.bf16.msra.mxu2 %v3172_v20  ;;  %v3460_v20 = vld [vmem:[#allocation7 + $0x94] sm:$0xf0] }
  0xea   :  { %1615 = vmatpush.bf16.msra.mxu0 %v2648_v24 }
  0xec   :  { %1825 = vmatpush.bf16.msra.mxu1 %v3758_v35  ;;  %2023 = vmatpush.bf16.msra.mxu2 %v3164_v34 }
  0xee   :  { %1616 = vmatpush.bf16.msra.mxu0 %v2552_v32  ;;  %v3465_v32 = vld [vmem:[#allocation7 + $0xc4] sm:$0xf] }
  0xf0   :  { %1826 = vmatpush.bf16.msra.mxu1 %v3761_v37 }
  0xf2   :  { %1617 = vmatpush.bf16.msra.mxu0 %v2456_v36  ;;  %v3165_v36 = vld [vmem:[#allocation7 + $0xc8] sm:$0xf0] }
  0xf4   :  { %1827 = vmatpush.bf16.msra.mxu1 %v3764_v41  ;;  %v3771_v42 = vpop.f32.mrf.mxu1  ;;  %v3774_v43 = vpop.f32.mrf.mxu0 }
  0xf5   :  { %1618 = vmatmul.bf16.vlgmr.msra.gmra.mxu0 %v3699_v50 }
  0xf6   :  { %2062 = vmatpush.bf16.msrb.mxu0 %v3732_v9 }
  0xfa   :  { %2063 = vmatpush.bf16.msrb.mxu0 %v3738_v13 }
  0xfb   :  { %v3777_v44 = vpop.f32.mrf.mxu2 }
  0xfc   :  { %v1426_v46 = vpop.f32.mrf.mxu1  ;;  %v1413_v50 = vpop.f32.mrf.mxu0 }
  0xfd   :  { %v3779_v45 = vpop.f32.mrf.mxu3  ;;  %v3168_v46 = vor.u32 %v3465_v32, %v3165_v36  ;;  %v3155_v50 = vld [vmem:[#allocation7 + $0xb0] sm:$0xf]  ;;  %v1626_v32 = vmul.f32 %v3744_v18, %v3744_v18  ;;  %v3131_v36 = vld [vmem:[#allocation7 + $0x80] sm:$0xf] }
  0xfe   :  { %2064 = vmatpush.bf16.msrb.mxu0 %v3741_v17 }
  0xff   :  { %2036 = vmatpush.bf16.msra.mxu3 %v3168_v46  ;;  %v1627_v46 = vmul.f32 %v3746_v19, %v3746_v19 }
 0x102   :  { %2065 = vmatpush.bf16.msrb.mxu0 %v3748_v23 }
 0x103   :  { %v1439_v47 = vpop.f32.mrf.mxu2 }
 0x104   :  { %v3464_v47 = vld [vmem:[#allocation7 + $0xb4] sm:$0xf0] }
 0x105   :  { %v1452_v48 = vpop.f32.mrf.mxu3 }
 0x106   :  { %2066 = vmatpush.bf16.msrb.mxu0 %v3751_v27  ;;  %v3463_v48 = vld [vmem:[#allocation7 + $0xb4] sm:$0xf] }
 0x107   :  { %v3160_v57 = vor.u32 %v3463_v48, %v3157_v53  ;;  %v3253_v53 = vld [vmem:[#allocation7 + $0x178] sm:$0xf0] }
 0x109   :  { %2037 = vmatpush.bf16.msra.mxu3 %v3160_v57 }
 0x10a   :  { %2067 = vmatpush.bf16.msrb.mxu0 %v3758_v35 }
 0x10e   :  { %2068 = vmatpush.bf16.msrb.mxu0 %v3761_v37 }
 0x112   :  { %2069 = vmatpush.bf16.msrb.mxu0 %v3764_v41 }
 0x114   :  { %v1476_v49 = vpop.f32.mrf.mxu1  ;;  %v3788_v61 = vpop.f32.mrf.mxu0 }
 0x115   :  { %v1635_v52 = vmul.f32 %v1476_v49, %v1476_v49 }
 0x117   :  { %v3786_v60 = vadd.f32 %v1635_v52, %v1623_v51  ;;  %v3156_v52 = vor.u32 %v3464_v47, %v3155_v50 }
 0x119   :  { %3504 = vrsqrt.f32 %v3786_v60  ;;  %2024 = vmatpush.bf16.msra.mxu2 %v3156_v52  ;;  %vm1666_vm1 = vcmp.eq.f32.partialorder %v3786_v60, inf  ;;  %vm1668_vm2 = vcmp.eq.f32.partialorder %v3786_v60, 0.0  ;;  %v3487_v52 = vld [vmem:[#allocation7 + $0x174] sm:$0xf] }
 0x11a   :  { %v3256_v57 = vor.u32 %v3487_v52, %v3253_v53 }
 0x11b   :  { %v1489_v39 = vpop.f32.mrf.mxu2 }
 0x11c   :  { %v1636_v6 = vmul.f32 %v1489_v39, %v1489_v39  ;;  %v1478_v8 = vpop.f32.mrf.mxu1  ;;  %v1465_v55 = vpop.f32.mrf.mxu0 }
 0x11d   :  { %v1502_v7 = vpop.f32.mrf.mxu3  ;;  %2025 = vmatpush.bf16.msra.mxu2 %v3148_v4  ;;  %v3459_v55 = vld [vmem:[#allocation7 + $0x94] sm:$0xf] }
 0x11e   :  { %v1637_v11 = vmul.f32 %v1502_v7, %v1502_v7  ;;  %v3795_v16 = vadd.f32 %v1636_v6, %v1624_v5  ;;  %v3149_v5 = vld [vmem:[#allocation7 + $0xa8] sm:$0xf0]  ;;  %v1669_v6 = vand.u32 2147483648, %v3786_v60  ;;  %v3144_v31 = vor.u32 %v3459_v55, %v3141_v59 }
 0x11f   :  { %v3505_v22 = vpop.eup %3504  ;;  %v3152_v8 = vor.u32 %v3461_v2, %v3149_v5  ;;  %v3245_v2 = vld [vmem:[#allocation7 + $0x168] sm:$0xf0] }
 0x120   :  { %v3797_v24 = vadd.f32 %v1637_v11, %v1625_v10  ;;  %v1660_v26 = vmul.f32 %v3505_v22, %v3786_v60  ;;  %3506 = vrsqrt.f32 %v3795_v16  ;;  %vm1678_vm3 = vcmp.eq.f32.partialorder %v3795_v16, inf }
 0x121   :  { %2038 = vmatpush.bf16.msra.mxu3 %v3152_v8  ;;  %vm1680_vm4 = vcmp.eq.f32.partialorder %v3795_v16, 0.0 }
 0x122   :  { %3508 = vrsqrt.f32 %v3797_v24  ;;  %v1661_v28 = vmul.f32 %v3505_v22, %v1660_v26  ;;  %v1681_v26 = vand.u32 2147483648, %v3795_v16  ;;  %vm1690_vm5 = vcmp.eq.f32.partialorder %v3797_v24, inf }
 0x123   :  { %v1491_v33 = vpop.f32.mrf.mxu2  ;;  %vm1692_vm6 = vcmp.eq.f32.partialorder %v3797_v24, 0.0 }
 0x124   :  { %v1662_v38 = vmul.f32 0.5, %v1661_v28  ;;  %v1693_v28 = vand.u32 2147483648, %v3797_v24 }
 0x125   :  { %v1504_v40 = vpop.f32.mrf.mxu3  ;;  %2039 = vmatpush.bf16.msra.mxu3 %v3144_v31  ;;  %v3479_v31 = vld [vmem:[#allocation7 + $0x134] sm:$0xf] }
 0x126   :  { %v3507_v49 = vpop.eup %3506  ;;  %v1663_v51 = vsub.f32 1.5, %v1662_v38  ;;  %v3458_v38 = vld [vmem:[#allocation7 + $0x84] sm:$0xf0]  ;;  %v3457_v40 = vld [vmem:[#allocation7 + $0x84] sm:$0xf] }
 0x127   :  { %v1672_v56 = vmul.f32 %v3507_v49, %v3795_v16 }
 0x128   :  { %v3509_v54 = vpop.eup %3508  ;;  %v1664_v58 = vmul.f32 %v3505_v22, %v1663_v51  ;;  %v3140_v22 = vor.u32 %v3460_v20, %v3139_v15  ;;  %v3133_v51 = vld [vmem:[#allocation7 + $0x88] sm:$0xf0] }
 0x129   :  { %v1684_v62 = vmul.f32 %v3509_v54, %v3797_v24  ;;  %v1673_v63 = vmul.f32 %v3507_v49, %v1672_v56  ;;  %v3136_v56 = vor.u32 %v3457_v40, %v3133_v51  ;;  %v3213_v51 = vld [vmem:[#allocation7 + $0x128] sm:$0xf0] }
 0x12a   :  { %v1665_v39 = vmul.f32 %v1664_v58, %v3786_v60  ;;  %2026 = vmatpush.bf16.msra.mxu2 %v3140_v22  ;;  %v3229_v22 = vld [vmem:[#allocation7 + $0x148] sm:$0xf0] }
 0x12b   :  { %v1685_v3 = vmul.f32 %v3509_v54, %v1684_v62  ;;  %v1674_v7 = vmul.f32 0.5, %v1673_v63  ;;  %2040 = vmatpush.bf16.msra.mxu3 %v3136_v56 }
 0x12c   :  { %v1667_v10 = vsel %vm1666_vm1, %v3786_v60, %v1665_v39 }
 0x12d   :  { %v1686_v11 = vmul.f32 0.5, %v1685_v3  ;;  %v1670_v12 = vsel %vm1668_vm2, %v1669_v6, %v1667_v10  ;;  %v1675_v14 = vsub.f32 1.5, %v1674_v7  ;;  %v1629_v6 = vmul.f32 %v3756_v30, %v3756_v30  ;;  %v3483_v10 = vld [vmem:[#allocation7 + $0x154] sm:$0xf] }
 0x12e   :  { %1803 = vst [vmem:[#allocation2] sm:$0x3] %v1670_v12 }
 0x12f   :  { %v1687_v21 = vsub.f32 1.5, %v1686_v11  ;;  %v1676_v25 = vmul.f32 %v3507_v49, %v1675_v14  ;;  %v3132_v49 = vor.u32 %v3458_v38, %v3131_v36  ;;  %2260 = vmatpush.bf16.msrb.mxu3 %v3732_v9  ;;  %v3237_v11 = vld [vmem:[#allocation7 + $0x158] sm:$0xf0] }
 0x130   :  { %v3240_v9 = vor.u32 %v3483_v10, %v3237_v11  ;;  %v3197_v10 = vld [vmem:[#allocation7 + $0x108] sm:$0xf0] }
 0x131   :  { %v1688_v60 = vmul.f32 %v3509_v54, %v1687_v21  ;;  %v1677_v33 = vmul.f32 %v1676_v25, %v3795_v16  ;;  %2027 = vmatpush.bf16.msra.mxu2 %v3132_v49  ;;  %v3481_v21 = vld [vmem:[#allocation7 + $0x144] sm:$0xf] }
 0x132   :  { %v3232_v25 = vor.u32 %v3481_v21, %v3229_v22  ;;  %v3477_v49 = vld [vmem:[#allocation7 + $0x124] sm:$0xf] }
 0x133   :  { %v1689_v50 = vmul.f32 %v1688_v60, %v3797_v24  ;;  %v1679_v18 = vsel %vm1678_vm3, %v3795_v16, %v1677_v33  ;;  %v3485_v16 = vld [vmem:[#allocation7 + $0x164] sm:$0xf]  ;;  %2261 = vmatpush.bf16.msrb.mxu3 %v3738_v13 }
 0x134   :  { %v1515_v34 = vpop.f32.mrf.mxu0  ;;  %v1528_v48 = vpop.f32.mrf.mxu1  ;;  %v1682_v58 = vsel %vm1680_vm4, %v1681_v26, %v1679_v18  ;;  %v3248_v5 = vor.u32 %v3485_v16, %v3245_v2  ;;  %v3216_v18 = vor.u32 %v3477_v49, %v3213_v51  ;;  %v3205_v2 = vld [vmem:[#allocation7 + $0x118] sm:$0xf0]  ;;  %v3488_v49 = vld [vmem:[#allocation7 + $0x174] sm:$0xf0] }
 0x135   :  { %v1638_v47 = vmul.f32 %v1515_v34, %v1515_v34  ;;  %v1639_v54 = vmul.f32 %v1528_v48, %v1528_v48  ;;  %v1691_v19 = vsel %vm1690_vm5, %v3797_v24, %v1689_v50  ;;  %1804 = vst [vmem:[#allocation2 + $0x2] sm:$0x3] %v1682_v58  ;;  %2215 = vmatpush.bf16.msrb.mxu2 %v3256_v57 }
 0x136   :  { %v1694_v63 = vsel %vm1692_vm6, %v1693_v28, %v1691_v19  ;;  %v1628_v24 = vmul.f32 %v3754_v29, %v3754_v29 }
 0x137   :  { %v3829_v62 = vadd.f32 %v1638_v47, %v1626_v32  ;;  %v3831_v0 = vadd.f32 %v1639_v54, %v1627_v46  ;;  %1805 = vst [vmem:[#allocation2 + $0x4] sm:$0x3] %v1694_v63  ;;  %2262 = vmatpush.bf16.msrb.mxu3 %v3741_v17  ;;  %v3221_v32 = vld [vmem:[#allocation7 + $0x138] sm:$0xf0] }
 0x138   :  { %v3224_v36 = vor.u32 %v3479_v31, %v3221_v32 }
 0x139   :  { %3510 = vrsqrt.f32 %v3829_v62  ;;  %2216 = vmatpush.bf16.msrb.mxu2 %v3248_v5  ;;  %vm1702_vm7 = vcmp.eq.f32.partialorder %v3829_v62, inf  ;;  %vm1704_vm8 = vcmp.eq.f32.partialorder %v3829_v62, 0.0  ;;  %vm1714_vm9 = vcmp.eq.f32.partialorder %v3831_v0, inf }
 0x13a   :  { %3512 = vrsqrt.f32 %v3831_v0  ;;  %v1717_v58 = vand.u32 2147483648, %v3831_v0  ;;  %vm1716_vm10 = vcmp.eq.f32.partialorder %v3831_v0, 0.0 }
 0x13b   :  { %v1541_v1 = vpop.f32.mrf.mxu2  ;;  %2263 = vmatpush.bf16.msrb.mxu3 %v3748_v23  ;;  %v1705_v23 = vand.u32 2147483648, %v3829_v62 }
 0x13c   :  { %v1640_v39 = vmul.f32 %v1541_v1, %v1541_v1  ;;  %v1517_v4 = vpop.f32.mrf.mxu0  ;;  %v1530_v8 = vpop.f32.mrf.mxu1  ;;  %v3475_v1 = vld [vmem:[#allocation7 + $0x114] sm:$0xf] }
 0x13d   :  { %v1554_v3 = vpop.f32.mrf.mxu3  ;;  %2217 = vmatpush.bf16.msrb.mxu2 %v3240_v9  ;;  %v1631_v4 = vmul.f32 %v3771_v42, %v3771_v42  ;;  %v3473_v8 = vld [vmem:[#allocation7 + $0x104] sm:$0xf] }
 0x13e   :  { %v1641_v7 = vmul.f32 %v1554_v3, %v1554_v3  ;;  %v3840_v12 = vadd.f32 %v1640_v39, %v1628_v24  ;;  %v3208_v3 = vor.u32 %v3475_v1, %v3205_v2  ;;  %v3200_v42 = vor.u32 %v3473_v8, %v3197_v10 }
 0x13f   :  { %v3511_v14 = vpop.eup %3510  ;;  %2264 = vmatpush.bf16.msrb.mxu3 %v3751_v27 }
 0x140   :  { %v3843_v15 = vadd.f32 %v1641_v7, %v1629_v6  ;;  %v3513_v29 = vpop.eup %3512  ;;  %v1696_v20 = vmul.f32 %v3511_v14, %v3829_v62  ;;  %3514 = vrsqrt.f32 %v3840_v12  ;;  %v1630_v6 = vmul.f32 %v3774_v43, %v3774_v43 }
 0x141   :  { %v1708_v30 = vmul.f32 %v3513_v29, %v3831_v0  ;;  %2218 = vmatpush.bf16.msrb.mxu2 %v3232_v25  ;;  %vm1726_vm11 = vcmp.eq.f32.partialorder %v3840_v12, inf  ;;  %vm1728_vm12 = vcmp.eq.f32.partialorder %v3840_v12, 0.0 }
 0x142   :  { %3516 = vrsqrt.f32 %v3843_v15  ;;  %v1697_v55 = vmul.f32 %v3511_v14, %v1696_v20  ;;  %vm1738_vm13 = vcmp.eq.f32.partialorder %v3843_v15, inf  ;;  %vm1740_vm14 = vcmp.eq.f32.partialorder %v3843_v15, 0.0 }
 0x143   :  { %v1709_v13 = vmul.f32 %v3513_v29, %v1708_v30  ;;  %v1543_v26 = vpop.f32.mrf.mxu2  ;;  %2265 = vmatpush.bf16.msrb.mxu3 %v3758_v35  ;;  %v1729_v35 = vand.u32 2147483648, %v3840_v12 }
 0x144   :  { %v1698_v59 = vmul.f32 0.5, %v1697_v55 }
 0x145   :  { %v1556_v60 = vpop.f32.mrf.mxu3  ;;  %v1710_v28 = vmul.f32 0.5, %v1709_v13  ;;  %2219 = vmatpush.bf16.msrb.mxu2 %v3224_v36 }
 0x146   :  { %v3515_v33 = vpop.eup %3514  ;;  %v1699_v34 = vsub.f32 1.5, %v1698_v59 }
 0x147   :  { %v1711_v40 = vsub.f32 1.5, %v1710_v28  ;;  %v1720_v46 = vmul.f32 %v3515_v33, %v3840_v12  ;;  %2266 = vmatpush.bf16.msrb.mxu3 %v3761_v37  ;;  %v1633_v28 = vmul.f32 %v3779_v45, %v3779_v45 }
 0x148   :  { %v3517_v38 = vpop.eup %3516  ;;  %v1700_v50 = vmul.f32 %v3511_v14, %v1699_v34 }
 0x149   :  { %v1732_v17 = vmul.f32 %v3517_v38, %v3843_v15  ;;  %v1712_v47 = vmul.f32 %v3513_v29, %v1711_v40  ;;  %v1721_v48 = vmul.f32 %v3515_v33, %v1720_v46  ;;  %2220 = vmatpush.bf16.msrb.mxu2 %v3216_v18  ;;  %v1741_v29 = vand.u32 2147483648, %v3843_v15 }
 0x14a   :  { %v1701_v52 = vmul.f32 %v1700_v50, %v3829_v62 }
 0x14b   :  { %v1733_v53 = vmul.f32 %v3517_v38, %v1732_v17  ;;  %v1713_v54 = vmul.f32 %v1712_v47, %v3831_v0  ;;  %v1722_v56 = vmul.f32 0.5, %v1721_v48  ;;  %2267 = vmatpush.bf16.msrb.mxu3 %v3764_v41  ;;  %v3251_v48 = vld [vmem:[#allocation7 + $0x170] sm:$0xf] }
 0x14c   :  { %v1703_v57 = vsel %vm1702_vm7, %v3829_v62, %v1701_v52 }
 0x14d   :  { %v1734_v19 = vmul.f32 0.5, %v1733_v53  ;;  %v1706_v63 = vsel %vm1704_vm8, %v1705_v23, %v1703_v57  ;;  %v1715_v16 = vsel %vm1714_vm9, %v3831_v0, %v1713_v54  ;;  %v1723_v27 = vsub.f32 1.5, %v1722_v56  ;;  %2221 = vmatpush.bf16.msrb.mxu2 %v3208_v3 }
 0x14e   :  { %1806 = vst [vmem:[#allocation2 + $0x6] sm:$0x3] %v1706_v63  ;;  %v1718_v24 = vsel %vm1716_vm10, %v1717_v58, %v1715_v16  ;;  %v3252_v53 = vor.u32 %v3488_v49, %v3251_v48  ;;  %v3243_v63 = vld [vmem:[#allocation7 + $0x160] sm:$0xf]  ;;  %v3486_v16 = vld [vmem:[#allocation7 + $0x164] sm:$0xf0] }
 0x14f   :  { %v1735_v39 = vsub.f32 1.5, %v1734_v19  ;;  %1807 = vst [vmem:[#allocation2 + $0x8] sm:$0x3] %v1718_v24  ;;  %v1724_v62 = vmul.f32 %v3515_v33, %v1723_v27  ;;  %v3244_v24 = vor.u32 %v3486_v16, %v3243_v63  ;;  %v3474_v48 = vld [vmem:[#allocation7 + $0x104] sm:$0xf0] }
 0x150   :  { %2201 = vmatpush.bf16.msrb.mxu1 %v3252_v53 }
 0x151   :  { %v1736_v5 = vmul.f32 %v3517_v38, %v1735_v39  ;;  %v1725_v0 = vmul.f32 %v1724_v62, %v3840_v12  ;;  %2222 = vmatpush.bf16.msrb.mxu2 %v3200_v42 }
 0x153   :  { %v1737_v11 = vmul.f32 %v1736_v5, %v3843_v15  ;;  %v1727_v43 = vsel %vm1726_vm11, %v3840_v12, %v1725_v0  ;;  %v3484_v0 = vld [vmem:[#allocation7 + $0x154] sm:$0xf0] }
 0x154   :  { %v1567_v7 = vpop.f32.mrf.mxu0  ;;  %v1580_v14 = vpop.f32.mrf.mxu1  ;;  %v1730_v30 = vsel %vm1728_vm12, %v1729_v35, %v1727_v43  ;;  %2202 = vmatpush.bf16.msrb.mxu1 %v3244_v24 }
 0x155   :  { %v1642_v9 = vmul.f32 %v1567_v7, %v1567_v7  ;;  %v1643_v20 = vmul.f32 %v1580_v14, %v1580_v14  ;;  %v1739_v21 = vsel %vm1738_vm13, %v3843_v15, %v1737_v11  ;;  %1808 = vst [vmem:[#allocation2 + $0xa] sm:$0x3] %v1730_v30  ;;  %v3884_v13 = vld [vmem:[#allocation2] sm:$0xff]  ;;  %v1632_v15 = vmul.f32 %v3777_v44, %v3777_v44  ;;  %v3227_v11 = vld [vmem:[#allocation7 + $0x140] sm:$0xf] }
 0x156   :  { %v1742_v55 = vsel %vm1740_vm14, %v1741_v29, %v1739_v21  ;;  %v1922_v12 = vpack.c.bf16 %v3884_v13, %v3884_v13  ;;  %v1634_v30 = vmul.f32 %v3788_v61, %v3788_v61 }
 0x157   :  { %v3880_v22 = vadd.f32 %v1642_v9, %v1630_v6  ;;  %v3882_v25 = vadd.f32 %v1643_v20, %v1631_v4  ;;  %1809 = vst [vmem:[#allocation2 + $0xc] sm:$0x3] %v1742_v55  ;;  %v3235_v6 = vld [vmem:[#allocation7 + $0x150] sm:$0xf]  ;;  %v3482_v9 = vld [vmem:[#allocation7 + $0x144] sm:$0xf0] }
 0x158   :  { %2028 = vmatmul.bf16.vlgmr.msra.gmra.mxu2 %v1922_v12  ;;  %2041 = vmatmul.bf16.vlgmr.msra.gmra.mxu3 %v1922_v12  ;;  %v3236_v35 = vor.u32 %v3484_v0, %v3235_v6  ;;  %v3228_v20 = vor.u32 %v3482_v9, %v3227_v11 }
 0x159   :  { %3518 = vrsqrt.f32 %v3880_v22  ;;  %vm1750_vm15 = vcmp.eq.f32.partialorder %v3880_v22, inf  ;;  %vm1752_vm1 = vcmp.eq.f32.partialorder %v3880_v22, 0.0  ;;  %v1753_v1 = vand.u32 2147483648, %v3880_v22 }
 0x15a   :  { %3520 = vrsqrt.f32 %v3882_v25  ;;  %vm1762_vm2 = vcmp.eq.f32.partialorder %v3882_v25, inf  ;;  %vm1764_vm3 = vcmp.eq.f32.partialorder %v3882_v25, 0.0  ;;  %v1765_v4 = vand.u32 2147483648, %v3882_v25  ;;  %2203 = vmatpush.bf16.msrb.mxu1 %v3236_v35 }
 0x15b   :  { %v1593_v37 = vpop.f32.mrf.mxu2 }
 0x15c   :  { %v1644_v26 = vmul.f32 %v1593_v37, %v1593_v37  ;;  %v1606_v59 = vpop.f32.mrf.mxu3  ;;  %v1569_v60 = vpop.f32.mrf.mxu0 }
 0x15d   :  { %v1645_v31 = vmul.f32 %v1606_v59, %v1606_v59  ;;  %v1582_v32 = vpop.f32.mrf.mxu1 }
 0x15e   :  { %v3895_v41 = vadd.f32 %v1644_v26, %v1632_v15  ;;  %2204 = vmatpush.bf16.msrb.mxu1 %v3228_v20 }
 0x15f   :  { %v3519_v33 = vpop.eup %3518  ;;  %v3897_v34 = vadd.f32 %v1645_v31, %v1633_v28  ;;  %v3219_v31 = vld [vmem:[#allocation7 + $0x130] sm:$0xf] }
 0x160   :  { %v3521_v36 = vpop.eup %3520  ;;  %v1744_v38 = vmul.f32 %v3519_v33, %v3880_v22  ;;  %3522 = vrsqrt.f32 %v3895_v41  ;;  %vm1774_vm4 = vcmp.eq.f32.partialorder %v3895_v41, inf  ;;  %vm1776_vm5 = vcmp.eq.f32.partialorder %v3895_v41, 0.0 }
 0x161   :  { %v1756_v44 = vmul.f32 %v3521_v36, %v3882_v25  ;;  %3524 = vrsqrt.f32 %v3897_v34  ;;  %vm1786_vm6 = vcmp.eq.f32.partialorder %v3897_v34, inf  ;;  %v1789_v12 = vand.u32 2147483648, %v3897_v34 }
 0x162   :  { %v1745_v40 = vmul.f32 %v3519_v33, %v1744_v38  ;;  %vm1788_vm7 = vcmp.eq.f32.partialorder %v3897_v34, 0.0 }
 0x163   :  { %v1757_v45 = vmul.f32 %v3521_v36, %v1756_v44  ;;  %v1595_v46 = vpop.f32.mrf.mxu2 }
 0x164   :  { %v1746_v50 = vmul.f32 0.5, %v1745_v40  ;;  %v1608_v17 = vpop.f32.mrf.mxu3 }
 0x165   :  { %v1758_v47 = vmul.f32 0.5, %v1757_v45  ;;  %v3476_v45 = vld [vmem:[#allocation7 + $0x114] sm:$0xf0] }
 0x166   :  { %v3523_v51 = vpop.eup %3522  ;;  %v1747_v52 = vsub.f32 1.5, %v1746_v50 }
 0x167   :  { %v3525_v18 = vpop.eup %3524  ;;  %v1759_v23 = vsub.f32 1.5, %v1758_v47  ;;  %v1768_v54 = vmul.f32 %v3523_v51, %v3895_v41  ;;  %v3195_v47 = vld [vmem:[#allocation7 + $0x100] sm:$0xf] }
 0x168   :  { %v1748_v56 = vmul.f32 %v3519_v33, %v1747_v52  ;;  %v1780_v57 = vmul.f32 %v3525_v18, %v3897_v34  ;;  %v3211_v33 = vld [vmem:[#allocation7 + $0x120] sm:$0xf] }
 0x169   :  { %v1760_v58 = vmul.f32 %v3521_v36, %v1759_v23  ;;  %v1769_v19 = vmul.f32 %v3523_v51, %v1768_v54  ;;  %v3478_v36 = vld [vmem:[#allocation7 + $0x124] sm:$0xf0] }
 0x16a   :  { %v1749_v27 = vmul.f32 %v1748_v56, %v3880_v22  ;;  %v1781_v2 = vmul.f32 %v3525_v18, %v1780_v57  ;;  %v3212_v40 = vor.u32 %v3478_v36, %v3211_v33 }
 0x16b   :  { %v1761_v39 = vmul.f32 %v1760_v58, %v3882_v25  ;;  %v1770_v3 = vmul.f32 0.5, %v1769_v19 }
 0x16c   :  { %v1751_v62 = vsel %vm1750_vm15, %v3880_v22, %v1749_v27  ;;  %v1782_v5 = vmul.f32 0.5, %v1781_v2  ;;  %v1777_v22 = vand.u32 2147483648, %v3895_v41 }
 0x16d   :  { %v1754_v7 = vsel %vm1752_vm1, %v1753_v1, %v1751_v62  ;;  %v1763_v8 = vsel %vm1762_vm2, %v3882_v25, %v1761_v39  ;;  %v1771_v10 = vsub.f32 1.5, %v1770_v3  ;;  %vm1842_vm1 = vcmask 255104  }
 0x16e   :  { %1810 = vst [vmem:[#allocation2 + $0xe] sm:$0x3] %v1754_v7  ;;  %v1766_v14 = vsel %vm1764_vm3, %v1765_v4, %v1763_v8  ;;  %v1783_v42 = vsub.f32 1.5, %v1782_v5  ;;  %vm1850_vm2 = vcmask 386304   ;;  %vm1858_vm3 = vcmask 517504  }
 0x16f   :  { %1811 = vst [vmem:[#allocation2 + $0x10] sm:$0x3] %v1766_v14  ;;  %v1772_v43 = vmul.f32 %v3523_v51, %v1771_v10  ;;  %v3196_v51 = vor.u32 %v3474_v48, %v3195_v47 }
 0x170   :  { %v1784_v29 = vmul.f32 %v3525_v18, %v1783_v42 }
 0x171   :  { %v1773_v21 = vmul.f32 %v1772_v43, %v3895_v41 }
 0x172   :  { %v1785_v55 = vmul.f32 %v1784_v29, %v3897_v34  ;;  %v1619_v25 = vpop.f32.mrf.mxu0 }
 0x173   :  { %v1775_v37 = vsel %vm1774_vm4, %v3895_v41, %v1773_v21  ;;  %v1646_v15 = vmul.f32 %v1619_v25, %v1619_v25  ;;  %v3480_v41 = vld [vmem:[#allocation7 + $0x134] sm:$0xf0]  ;;  %vm1866_vm4 = vcmask 648704  }
 0x174   :  { %v1778_v26 = vsel %vm1776_vm5, %v1777_v22, %v1775_v37  ;;  %v1787_v61 = vsel %vm1786_vm6, %v3897_v34, %v1785_v55  ;;  %v3220_v38 = vor.u32 %v3480_v41, %v3219_v31  ;;  %v3203_v34 = vld [vmem:[#allocation7 + $0x110] sm:$0xf]  ;;  %vm1872_vm5 = vcmask 779904  }
 0x175   :  { %1812 = vst [vmem:[#allocation2 + $0x12] sm:$0x3] %v1778_v26  ;;  %v1790_v59 = vsel %vm1788_vm7, %v1789_v12, %v1787_v61  ;;  %v1658_v60 = vadd.f32 %v1646_v15, %v1634_v30  ;;  %v1816_v28 = vld [vmem:[#allocation2 + $0x8] sm:$0xff]  ;;  %v3204_v17 = vor.u32 %v3476_v45, %v3203_v34  ;;  %vm1880_vm6 = vcmask 911104  }
 0x176   :  { %1813 = vst [vmem:[#allocation2 + $0x14] sm:$0x3] %v1790_v59  ;;  %v1818_v32 = vpack.c.bf16 %v1816_v28, %v3884_v13  ;;  %2205 = vmatpush.bf16.msrb.mxu1 %v3220_v38  ;;  %vm1888_vm7 = vcmask 1042304  }
 0x177   :  { %3526 = vrsqrt.f32 %v1658_v60  ;;  %vm1798_vm8 = vcmp.eq.f32.partialorder %v1658_v60, inf  ;;  %v1801_v23 = vand.u32 2147483648, %v1658_v60  ;;  %vm1800_vm9 = vcmp.eq.f32.partialorder %v1658_v60, 0.0 }
 0x178   :  { %1828 = vmatmul.bf16.vlgmr.msra.gmra.mxu1 %v1818_v32  ;;  %2223 = vmatmul.bf16.vlgmr.msrb.gmra.mxu2 %v1818_v32 }
 0x17a   :  { %v1621_v44 = vpop.f32.mrf.mxu0  ;;  %2206 = vmatpush.bf16.msrb.mxu1 %v3212_v40 }
 0x17d   :  { %v3527_v46 = vpop.eup %3526 }
 0x17e   :  { %v1792_v50 = vmul.f32 %v3527_v46, %v1658_v60  ;;  %2207 = vmatpush.bf16.msrb.mxu1 %v3204_v17 }
 0x180   :  { %v1793_v49 = vmul.f32 %v3527_v46, %v1792_v50 }
 0x182   :  { %v1794_v13 = vmul.f32 0.5, %v1793_v49  ;;  %2208 = vmatpush.bf16.msrb.mxu1 %v3196_v51 }
 0x184   :  { %v1795_v52 = vsub.f32 1.5, %v1794_v13 }
 0x186   :  { %v1796_v53 = vmul.f32 %v3527_v46, %v1795_v52 }
 0x188   :  { %v1797_v18 = vmul.f32 %v1796_v53, %v1658_v60 }
 0x18a   :  { %v1799_v54 = vsel %vm1798_vm8, %v1658_v60, %v1797_v18 }
 0x18b   :  { %v1802_v56 = vsel %vm1800_vm9, %v1801_v23, %v1799_v54 }
 0x18c   :  { %1814 = vst [vmem:[#allocation2 + $0x16] sm:$0x3] %v1802_v56 }
 0x193   :  { %v1817_v57 = vld [vmem:[#allocation2 + $0x10] sm:$0xff] }
 0x194   :  { %v1819_v58 = vpack.c.bf16 %v1817_v57, %v1817_v57 }
 0x196   :  { %1833 = vmatmul.bf16.gmra.mxu1 %v1819_v58 }
 0x1a6   :  { %2209 = vmatmul.bf16.vlgmr.msrb.gmra.mxu1 %v1818_v32 }
 0x1db   :  { %v2029_v19 = vpop.f32.mrf.mxu2  ;;  %v2042_v63 = vpop.f32.mrf.mxu3 }
 0x1dc   :  { %v2046_v16 = vmul.f32 %v2029_v19, %v2029_v19  ;;  %v2047_v27 = vmul.f32 %v2042_v63, %v2042_v63 }
 0x1de   :  { %v2048_v1 = vadd.f32 %v2047_v27, %v2046_v16 }
 0x1e0   :  { %3528 = vrsqrt.f32 %v2048_v1  ;;  %vm2056_vm10 = vcmp.eq.f32.partialorder %v2048_v1, inf  ;;  %v2059_v8 = vand.u32 2147483648, %v2048_v1  ;;  %vm2058_vm11 = vcmp.eq.f32.partialorder %v2048_v1, 0.0 }
 0x1e3   :  { %v2031_v2 = vpop.f32.mrf.mxu2  ;;  %v2044_v24 = vpop.f32.mrf.mxu3 }
 0x1e6   :  { %v3529_v39 = vpop.eup %3528 }
 0x1e7   :  { %v2050_v3 = vmul.f32 %v3529_v39, %v2048_v1 }
 0x1e9   :  { %v2051_v62 = vmul.f32 %v3529_v39, %v2050_v3 }
 0x1eb   :  { %v2052_v4 = vmul.f32 0.5, %v2051_v62 }
 0x1ed   :  { %v2053_v5 = vsub.f32 1.5, %v2052_v4 }
 0x1ef   :  { %v2054_v6 = vmul.f32 %v3529_v39, %v2053_v5 }
 0x1f1   :  { %v2055_v7 = vmul.f32 %v2054_v6, %v2048_v1 }
 0x1f3   :  { %v2057_v10 = vsel %vm2056_vm10, %v2048_v1, %v2055_v7 }
 0x1f4   :  { %v2060_v35 = vsel %vm2058_vm11, %v2059_v8, %v2057_v10 }
 0x1f5   :  { %v1829_v0 = vpop.f32.mrf.mxu1  ;;  %v2061_v11 = vpack.c.bf16 %v2060_v35, %v2060_v35 }
 0x1f6   :  { %1844 = vst.sshfl [vmem:[#allocation1] sm:$0xff pattern:$0x73625140] %v1829_v0  ;;  %1839 = vrot.lane.b32.xlu0 %v1829_v0, %s3654_s13 }
 0x1f7   :  { %2070 = vmatmul.bf16.vlgmr.msrb.gmra.mxu0 %v2061_v11 }
 0x1fb   :  { %v2224_v22 = vpop.f32.mrf.mxu2 }
 0x1fc   :  { %v2231_v25 = vmul.f32 %v2224_v22, %v2224_v22 }
 0x1fd   :  { %v1846_v9 = vld [vmem:[#allocation1 + $0x1] ss:$4 sm:$0xff]  ;;  %v1831_v14 = vpop.f32.mrf.mxu1 }
 0x1fe   :  { %1852 = vst.sshfl [vmem:[#allocation1] sm:$0xff pattern:$0x73625140] %v1829_v0  ;;  %1847 = vrot.lane.b32.xlu0 %v1846_v9, %s3655_s14  ;;  %1869 = vrot.lane.b32.xlu2 %v1831_v14, %s3656_s15 }
 0x203   :  { %v2226_v26 = vpop.f32.mrf.mxu2 }
 0x204   :  { %v2232_v59 = vmul.f32 %v2226_v26, %v2226_v26 }
 0x205   :  { %v1854_v42 = vld [vmem:[#allocation1 + $0x2] ss:$4 sm:$0xff] }
 0x206   :  { %1860 = vst.sshfl [vmem:[#allocation1] sm:$0xff pattern:$0x73625140] %v1829_v0  ;;  %1855 = vrot.lane.b32.xlu1 %v1854_v42, %s3657_s16 }
 0x20d   :  { %v1862_v43 = vld [vmem:[#allocation1 + $0x3] ss:$4 sm:$0xff] }
 0x20e   :  { %1874 = vst.sshfl [vmem:[#allocation1] sm:$0xff pattern:$0x73625140] %v1831_v14 }
 0x213   :  { %v1834_v29 = vpop.f32.mrf.mxu1 }
 0x214   :  { %1896 = vrot.lane.b32.xlu1 %v1834_v29, %s3654_s13 }
 0x215   :  { %v1876_v20 = vld [vmem:[#allocation1 + $0x1] ss:$4 sm:$0xff] }
 0x216   :  { %1882 = vst.sshfl [vmem:[#allocation1] sm:$0xff pattern:$0x73625140] %v1831_v14  ;;  %1877 = vrot.lane.b32.xlu2 %v1876_v20, %s3646_s24 }
 0x21b   :  { %v1836_v30 = vpop.f32.mrf.mxu1 }
 0x21c   :  { %1863 = vrot.lane.b32.xlu1 %v1862_v43, %s3652_s11 }
 0x21d   :  { %v3937_v21 = vld [vmem:[#allocation1 + $0x2] ss:$4 sm:$0xff] }
 0x21e   :  { %1890 = vst.sshfl [vmem:[#allocation1] sm:$0xff pattern:$0x73625140] %v1831_v14 }
 0x223   :  { %v2210_v55 = vpop.f32.mrf.mxu1 }
 0x224   :  { %v2229_v37 = vmul.f32 %v2210_v55, %v2210_v55 }
 0x225   :  { %v1892_v12 = vld [vmem:[#allocation1 + $0x3] ss:$4 sm:$0xff] }
 0x226   :  { %1894 = vst.msk [vmem:[%s4054_s4 + $0x2] sm:$0x3] %vm157_vm0, %v1892_v12  ;;  %v2233_v15 = vadd.f32 %v2231_v25, %v2229_v37 }
 0x227   :  { %1900 = vst.sshfl [vmem:[#allocation1] sm:$0xff pattern:$0x73625140] %v1834_v29 }
 0x228   :  { %3530 = vrsqrt.f32 %v2233_v15  ;;  %vm2242_vm12 = vcmp.eq.f32.partialorder %v2233_v15, inf  ;;  %v2245_v52 = vand.u32 2147483648, %v2233_v15  ;;  %vm2244_vm14 = vcmp.eq.f32.partialorder %v2233_v15, 0.0 }
 0x22b   :  { %v2212_v61 = vpop.f32.mrf.mxu1 }
 0x22c   :  { %v2230_v60 = vmul.f32 %v2212_v61, %v2212_v61 }
 0x22e   :  { %v3531_v28 = vpop.eup %3530  ;;  %v1902_v31 = vld [vmem:[#allocation1 + $0x1] ss:$4 sm:$0xff]  ;;  %v2234_v32 = vadd.f32 %v2232_v59, %v2230_v60 }
 0x22f   :  { %1907 = vst.sshfl [vmem:[#allocation1] sm:$0xff pattern:$0x73625140] %v1834_v29  ;;  %1903 = vrot.lane.b32.xlu0 %v1902_v31, %s3655_s14  ;;  %v2236_v41 = vmul.f32 %v3531_v28, %v2233_v15 }
 0x230   :  { %3532 = vrsqrt.f32 %v2234_v32  ;;  %vm2254_vm13 = vcmp.eq.f32.partialorder %v2234_v32, inf  ;;  %v2257_v53 = vand.u32 2147483648, %v2234_v32  ;;  %vm2256_vm15 = vcmp.eq.f32.partialorder %v2234_v32, 0.0 }
 0x231   :  { %v2237_v33 = vmul.f32 %v3531_v28, %v2236_v41 }
 0x233   :  { %v2238_v36 = vmul.f32 0.5, %v2237_v33 }
 0x235   :  { %v2239_v38 = vsub.f32 1.5, %v2238_v36 }
 0x236   :  { %v3533_v44 = vpop.eup %3532  ;;  %v1909_v40 = vld [vmem:[#allocation1 + $0x2] ss:$4 sm:$0xff] }
 0x237   :  { %1914 = vst.sshfl [vmem:[#allocation1] sm:$0xff pattern:$0x73625140] %v1834_v29  ;;  %1910 = vrot.lane.b32.xlu1 %v1909_v40, %s3657_s16  ;;  %v2248_v34 = vmul.f32 %v3533_v44, %v2234_v32  ;;  %v2240_v45 = vmul.f32 %v3531_v28, %v2239_v38 }
 0x239   :  { %v2249_v46 = vmul.f32 %v3533_v44, %v2248_v34  ;;  %v2241_v17 = vmul.f32 %v2240_v45, %v2233_v15 }
 0x23b   :  { %v2250_v50 = vmul.f32 0.5, %v2249_v46  ;;  %v2243_v13 = vsel %vm2242_vm12, %v2233_v15, %v2241_v17 }
 0x23c   :  { %v2246_v23 = vsel %vm2244_vm14, %v2245_v52, %v2243_v13 }
 0x23d   :  { %v2251_v47 = vsub.f32 1.5, %v2250_v50 }
 0x23e   :  { %v1916_v48 = vld [vmem:[#allocation1 + $0x3] ss:$4 sm:$0xff] }
 0x23f   :  { %1917 = vrot.lane.b32.xlu0 %v1916_v48, %s3652_s11  ;;  %v2252_v49 = vmul.f32 %v3533_v44, %v2251_v47 }
 0x241   :  { %v2253_v51 = vmul.f32 %v2252_v49, %v2234_v32 }
 0x243   :  { %v2255_v18 = vsel %vm2254_vm13, %v2234_v32, %v2253_v51 }
 0x244   :  { %v2258_v54 = vsel %vm2256_vm15, %v2257_v53, %v2255_v18 }
 0x245   :  { %v2259_v56 = vpack.c.bf16 %v2258_v54, %v2246_v23 }
 0x247   :  { %2268 = vmatmul.bf16.vlgmr.msrb.gmra.mxu3 %v2259_v56 }
 0x258   :  { %v1870_v2 = vpop.permute.xlu2 %1869 }
 0x268   :  { %v1840_v57 = vpop.permute.xlu0 %1839 }
 0x269   :  { %1843 = vst.msk [vmem:[%s4054_s4] sm:$0x3] %vm1842_vm1, %v1840_v57 }
 0x270   :  { %v1848_v58 = vpop.permute.xlu0 %1847  ;;  %v1878_v3 = vpop.permute.xlu2 %1877 }
 0x271   :  { %1851 = vst.msk [vmem:[%s4054_s4] sm:$0x3] %vm1850_vm2, %v1848_v58 }
 0x274   :  { %v2071_v63 = vpop.f32.mrf.mxu0 }
 0x275   :  { %2080 = vst.sshfl [vmem:[#allocation1] sm:$0xff pattern:$0x73625140] %v2071_v63  ;;  %2076 = vrot.lane.b32.xlu2 %v2071_v63, %s3656_s15 }
 0x278   :  { %v1856_v19 = vpop.permute.xlu1 %1855 }
 0x279   :  { %1859 = vst.msk [vmem:[%s4054_s4] sm:$0x3] %vm1858_vm3, %v1856_v19 }
 0x27c   :  { %v2073_v16 = vpop.f32.mrf.mxu0  ;;  %v2082_v27 = vld [vmem:[#allocation1 + $0x1] ss:$4 sm:$0xff] }
 0x27d   :  { %2083 = vrot.lane.b32.xlu1 %v2082_v27, %s3658_s26  ;;  %2087 = vst.sshfl [vmem:[#allocation1] sm:$0xff pattern:$0x73625140] %v2071_v63 }
 0x284   :  { %v2089_v24 = vld [vmem:[#allocation1 + $0x2] ss:$4 sm:$0xff] }
 0x285   :  { %2090 = vrot.lane.b32.xlu0 %v2089_v24, %s3654_s13  ;;  %2094 = vst.sshfl [vmem:[#allocation1] sm:$0xff pattern:$0x73625140] %v2071_v63 }
 0x286   :  { %v1897_v1 = vpop.permute.xlu1 %1896 }
 0x287   :  { %1899 = vst.msk [vmem:[%s4054_s4 + $0x2] sm:$0x3] %vm1842_vm1, %v1897_v1 }
 0x28c   :  { %v2096_v62 = vld [vmem:[#allocation1 + $0x3] ss:$4 sm:$0xff] }
 0x28d   :  { %2097 = vrot.lane.b32.xlu2 %v2096_v62, %s3657_s16 }
 0x28e   :  { %v1864_v39 = vpop.permute.xlu1 %1863 }
 0x28f   :  { %1867 = vst.msk [vmem:[%s4054_s4] sm:$0x3] %vm1866_vm4, %v1864_v39 }
 0x290   :  { %1873 = vst.msk [vmem:[%s4054_s4] sm:$0x3] %vm1872_vm5, %v1870_v2 }
 0x291   :  { %1881 = vst.msk [vmem:[%s4054_s4] sm:$0x3] %vm1880_vm6, %v1878_v3 }
 0x2a1   :  { %v1904_v4 = vpop.permute.xlu0 %1903 }
 0x2a2   :  { %1906 = vst.msk [vmem:[%s4054_s4 + $0x2] sm:$0x3] %vm1850_vm2, %v1904_v4 }
 0x2a9   :  { %v1911_v5 = vpop.permute.xlu1 %1910 }
 0x2aa   :  { %1913 = vst.msk [vmem:[%s4054_s4 + $0x2] sm:$0x3] %vm1858_vm3, %v1911_v5 }
 0x2b1   :  { %v1918_v6 = vpop.permute.xlu0 %1917 }
 0x2b2   :  { %1920 = vst.msk [vmem:[%s4054_s4 + $0x2] sm:$0x3] %vm1866_vm4, %v1918_v6 }
 0x2ca   :  { %v2269_v0 = vpop.f32.mrf.mxu3 }
 0x2cb   :  { %2279 = vst.sshfl [vmem:[#allocation1] sm:$0xff pattern:$0x73625140] %v2269_v0 }
 0x2cf   :  { %v2077_v10 = vpop.permute.xlu2 %2076 }
 0x2d0   :  { %2079 = vst.msk [vmem:[%s4054_s4 + $0x2] sm:$0x3] %vm1872_vm5, %v2077_v10 }
 0x2d2   :  { %v2281_v7 = vld [vmem:[#allocation1 + $0x1] ss:$4 sm:$0xff]  ;;  %v2271_v8 = vpop.f32.mrf.mxu3 }
 0x2d3   :  { %2284 = vst.sshfl [vmem:[#allocation1] sm:$0xff pattern:$0x73625140] %v2269_v0  ;;  %2299 = vrot.lane.b32.xlu0 %v2271_v8, %s3656_s15 }
 0x2da   :  { %v2286_v35 = vld [vmem:[#allocation1 + $0x2] ss:$4 sm:$0xff] }
 0x2db   :  { %1885 = vrot.lane.b32.xlu0 %v3937_v21, %s3658_s26  ;;  %2287 = vrot.lane.b32.xlu2 %v2286_v35, %s3655_s14  ;;  %2291 = vst.sshfl [vmem:[#allocation1] sm:$0xff pattern:$0x73625140] %v2269_v0 }
 0x2e2   :  { %v2293_v11 = vld [vmem:[#allocation1 + $0x3] ss:$4 sm:$0xff] }
 0x2e3   :  { %2294 = vrot.lane.b32.xlu1 %v2293_v11, %s3652_s11  ;;  %2303 = vst.sshfl [vmem:[#allocation1] sm:$0xff pattern:$0x73625140] %v2271_v8 }
 0x2e7   :  { %v2098_v20 = vpop.permute.xlu2 %2097 }
 0x2ea   :  { %v2305_v9 = vld [vmem:[#allocation1 + $0x1] ss:$4 sm:$0xff] }
 0x2eb   :  { %2275 = vrot.lane.b32.xlu1 %v2269_v0, %s3646_s24  ;;  %2306 = vrot.lane.b32.xlu2 %v2305_v9, %s3646_s24  ;;  %2310 = vst.sshfl [vmem:[#allocation1] sm:$0xff pattern:$0x73625140] %v2271_v8 }
 0x2ef   :  { %v2084_v42 = vpop.permute.xlu1 %2083 }
 0x2f0   :  { %2086 = vst.msk [vmem:[%s4054_s4 + $0x2] sm:$0x3] %vm1888_vm7, %v2084_v42 }
 0x2f2   :  { %v2312_v14 = vld [vmem:[#allocation1 + $0x2] ss:$4 sm:$0xff] }
 0x2f3   :  { %2313 = vrot.lane.b32.xlu2 %v2312_v14, %s3658_s26  ;;  %2317 = vst.sshfl [vmem:[#allocation1] sm:$0xff pattern:$0x73625140] %v2271_v8 }
 0x2f7   :  { %v2091_v29 = vpop.permute.xlu0 %2090 }
 0x2f8   :  { %2093 = vst.msk [vmem:[%s4054_s4 + $0x4] sm:$0x3] %vm1842_vm1, %v2091_v29 }
 0x2f9   :  { %2100 = vst.msk [vmem:[%s4054_s4 + $0x4] sm:$0x3] %vm1858_vm3, %v2098_v20 }
 0x2fa   :  { %v2319_v43 = vld [vmem:[#allocation1 + $0x3] ss:$4 sm:$0xff]  ;;  %2283 = vst.msk [vmem:[%s4054_s4 + $0x4] sm:$0x3] %vm157_vm0, %v2281_v7 }
 0x2fb   :  { %2321 = vst.msk [vmem:[%s4054_s4 + $0x6] sm:$0x3] %vm157_vm0, %v2319_v43 }
 0x335   :  { %v2288_v30 = vpop.permute.xlu2 %2287 }
 0x336   :  { %2290 = vst.msk [vmem:[%s4054_s4 + $0x4] sm:$0x3] %vm1850_vm2, %v2288_v30 }
 0x345   :  { %v2300_v21 = vpop.permute.xlu0 %2299  ;;  %v2307_v55 = vpop.permute.xlu2 %2306 }
 0x34d   :  { %v1886_v22 = vpop.permute.xlu0 %1885  ;;  %v2314_v37 = vpop.permute.xlu2 %2313 }
 0x34e   :  { %1889 = vst.msk [vmem:[%s4054_s4] sm:$0x3] %vm1888_vm7, %v1886_v22 }
 0x355   :  { %v2295_v25 = vpop.permute.xlu1 %2294 }
 0x356   :  { %2297 = vst.msk [vmem:[%s4054_s4 + $0x4] sm:$0x3] %vm1866_vm4, %v2295_v25 }
 0x357   :  { %2302 = vst.msk [vmem:[%s4054_s4 + $0x4] sm:$0x3] %vm1872_vm5, %v2300_v21 }
 0x358   :  { %2309 = vst.msk [vmem:[%s4054_s4 + $0x4] sm:$0x3] %vm1880_vm6, %v2307_v55 }
 0x359   :  { %2316 = vst.msk [vmem:[%s4054_s4 + $0x4] sm:$0x3] %vm1888_vm7, %v2314_v37 }
 0x35d   :  { %v2276_v12 = vpop.permute.xlu1 %2275 }
 0x35e   :  { %2278 = vst.msk [vmem:[%s4054_s4 + $0x2] sm:$0x3] %vm1880_vm6, %v2276_v12 }
 0x35f   :  { %2326 = vsyncpa [#allocation4], 1 }
 0x360   :  { %2327 = vsyncpa [#allocation6], 1 }
 0x361   :  { %2328 = vsyncpa [#allocation9], 1 }

</bundles_post_ra>
